<compile_context>
chip_gen: v7x
topology: tpu7x:2x2x1
jax: 0.10.0
libtpu: 0.0.40
codegen_flags: <defaults>
</compile_context>

<pallas_src>
import functools
import numpy as np

import jax
import jax.numpy as jnp
from jax.experimental import pallas as pl
from jax.experimental.pallas import tpu as pltpu


def _lstm_cell(gates, c_prev, H):
    """PyTorch LSTM cell from pre-activation gates (i, f, g, o order).

    The g-gate pre-activation is pre-scaled by 2 (weights & bias, exact in
    bf16), so tanh(x) = 2*sigmoid(2x) - 1 and a single full-width sigmoid
    covers all four gates (one EUP transcendental per layer-step)."""
    sig = jax.nn.sigmoid(gates)
    i = sig[:, 0 * H:1 * H]
    f = sig[:, 1 * H:2 * H]
    g = 2.0 * sig[:, 2 * H:3 * H] - 1.0
    o = sig[:, 3 * H:4 * H]
    c_new = f * c_prev + i * g
    return o * jnp.tanh(c_new), c_new


def decoder_kernel(feat_ref, ids_ref, emb_ref, wih0_ref, wstack_ref, wcat_ref,
                   b_ref, wlin_ref, blin_ref, out_ref, hid_ref, *,
                   num_layers, hidden, num_steps, batch, vocab):
    H, L, T, B, V = hidden, num_layers, num_steps, batch, vocab
    f32, bf16 = jnp.float32, jnp.bfloat16

    # ---- hoisted ref loads (Mosaic does not CSE ref reads across the unroll) ----
    bias = b_ref[...]                        # (L, 4H) f32, g entries pre-scaled x2
    w_stack = wstack_ref[...]                # (3H, 4H) bf16 = [Whh0^T; Wih1^T; Whh1^T]

    # ---- in-kernel embedding lookup as a one-hot MXU matmul (no gather) ----
    # ids: time-major (T*B, 1); rows 0..B-1 hold -1 (feature timestep -> zero row).
    ids = ids_ref[...]
    lane = jax.lax.broadcasted_iota(jnp.int32, (T * B, V), 1)
    onehot = jnp.where(ids == lane, 1.0, 0.0).astype(bf16)              # (T*B, V)
    emb_all = jnp.dot(onehot, emb_ref[...], preferred_element_type=f32)  # (T*B, E)
    x_all = (feat_ref[...] + emb_all).astype(bf16)   # feature pre-padded to (T*B, E)

    # ---- hoisted layer-0 input projection for ALL timesteps; bias0 folded once ----
    gx0 = (jnp.dot(x_all, wih0_ref[...], preferred_element_type=f32)
           + jnp.broadcast_to(bias[0:1, :], (T * B, 4 * H)))            # (T*B, 4H)

    zb = jnp.zeros((B, H), bf16)
    h = [jnp.zeros((B, H), f32) for _ in range(L)]
    c = [jnp.zeros((B, H), f32) for _ in range(L)]

    if L == 1:
        whh0 = w_stack[:H]
        for t in range(T):                   # static unroll over time
            gates0 = gx0[t * B:(t + 1) * B] + jnp.dot(
                h[0].astype(bf16), whh0, preferred_element_type=f32)
            h[0], c[0] = _lstm_cell(gates0, c[0], H)
            hid_ref[t * B:(t + 1) * B, :] = h[0]
    else:
        # hoisted bias broadcasts & deep-layer weight loads
        b1 = jnp.broadcast_to(bias[1:2, :], (B, 4 * H))
        deep = [(wcat_ref[l - 2], jnp.broadcast_to(bias[l:l + 1, :], (B, 4 * H)))
                for l in range(2, L)]
        rec0 = jnp.zeros((B, 4 * H), f32)    # h0_{-1} @ Whh0 == 0
        for t in range(T):                   # static unroll over time
            # layer 0, step t: precomputed input proj + bias + recurrent term
            h[0], c[0] = _lstm_cell(gx0[t * B:(t + 1) * B] + rec0, c[0], H)
            # ONE fused (2B, 3H) x (3H, 4H) MXU push per step:
            #   rows 0..B-1  : h0_t @ Whh0                  -> layer-0 recurrence, t+1
            #   rows B..2B-1 : h0_t @ Wih1 + h1_{t-1}@Whh1  -> layer-1 gates, step t
            h0b = h[0].astype(bf16)
            top = jnp.concatenate([h0b, zb, zb], axis=1)                 # (B, 3H)
            bot = jnp.concatenate([zb, h0b, h[1].astype(bf16)], axis=1)  # (B, 3H)
            fused = jnp.dot(jnp.concatenate([top, bot], axis=0), w_stack,
                            preferred_element_type=f32)                  # (2B, 4H)
            rec0 = fused[:B]
            h[1], c[1] = _lstm_cell(fused[B:] + b1, c[1], H)
            x_in = h[1]
            for l in range(2, L):            # layers >= 2: fused [x, h] @ Wcat
                wcat_l, bl = deep[l - 2]
                xh = jnp.concatenate([x_in, h[l]], axis=1).astype(bf16)  # (B, 2H)
                h[l], c[l] = _lstm_cell(
                    jnp.dot(xh, wcat_l, preferred_element_type=f32) + bl, c[l], H)
                x_in = h[l]
            # top-layer hidden -> VMEM slab (keeps it out of vregs across the unroll)
            hid_ref[t * B:(t + 1) * B, :] = x_in

    # ---- head: Linear + LogSoftmax on the full slab; one lane-dense writeback ----
    logits = (jnp.dot(hid_ref[...].astype(bf16), wlin_ref[...],
                      preferred_element_type=f32)
              + jnp.broadcast_to(blin_ref[...], (T * B, V)))
    m = jnp.max(logits, axis=-1, keepdims=True)
    s = logits - m
    lse = jnp.log(jnp.sum(jnp.exp(s), axis=-1, keepdims=True))
    out_ref[...] = s - lse


def decoder_forward(captions, feature, emb_table, wih, whh, b_ih, b_hh, w_lin, b_lin):
    """Fused decoder forward (embedding + feature prepend + L-layer LSTM + Linear +
    LogSoftmax) as ONE grid-less VMEM-resident pallas_call.
    captions: (B, S) int32; feature: (B, E); emb_table: (V, E);
    wih/whh: (L, 4H, E)/(L, 4H, H) PyTorch-layout weights.
    Returns (T*B, V) f32 log-probs, time-major flat (row = t*B + b), T = S + 1."""
    B, S = captions.shape
    V, E = emb_table.shape
    L, H4, H = whh.shape
    T = S + 1
    assert H4 == 4 * H
    f32, bf16 = jnp.float32, jnp.bfloat16

    # g-gate columns pre-scaled by 2 (exact in bf16) -> tanh via 2*sigmoid(2x)-1.
    gscale = jnp.concatenate([jnp.ones((2 * H,), f32),
                              jnp.full((H,), 2.0, f32),
                              jnp.ones((H,), f32)])

    # Time-major flat token ids; feature rows (t=0) get -1 -> all-zero one-hot row.
    ids_tm = jnp.concatenate(
        [jnp.full((B, 1), -1, jnp.int32),
         jnp.transpose(captions).reshape(S * B, 1).astype(jnp.int32)], axis=0)
    feat_full = jnp.concatenate([feature.astype(f32),
                                 jnp.zeros((S * B, E), f32)], axis=0)       # (T*B, E)

    wih0_t = (jnp.transpose(wih[0]) * gscale[None, :]).astype(bf16)         # (E, 4H)
    if L >= 2:
        wstack = jnp.concatenate([jnp.transpose(whh[0]), jnp.transpose(wih[1]),
                                  jnp.transpose(whh[1])], axis=0)           # (3H, 4H)
    else:
        wstack = jnp.concatenate([jnp.transpose(whh[0]),
                                  jnp.zeros((2 * H, 4 * H), f32)], axis=0)
    wstack = (wstack * gscale[None, :]).astype(bf16)
    if L > 2:
        wcat = jnp.concatenate([jnp.transpose(wih[2:], (0, 2, 1)),
                                jnp.transpose(whh[2:], (0, 2, 1))], axis=1)  # (L-2, 2H, 4H)
        wcat = (wcat * gscale[None, None, :]).astype(bf16)
    else:
        wcat = jnp.zeros((1, 2 * H, 4 * H), bf16)                            # unused dummy
    bias = ((b_ih + b_hh) * gscale[None, :]).astype(f32)                     # (L, 4H)
    wlin_t = jnp.transpose(w_lin).astype(bf16)                               # (H, V)
    blin = b_lin.reshape(1, V).astype(f32)

    kernel = functools.partial(decoder_kernel, num_layers=L, hidden=H,
                               num_steps=T, batch=B, vocab=V)
    vmem = pl.BlockSpec(memory_space=pltpu.MemorySpace.VMEM)
    return pl.pallas_call(
        kernel,
        out_shape=jax.ShapeDtypeStruct((T * B, V), f32),
        in_specs=[vmem] * 9,
        out_specs=vmem,
        scratch_shapes=[pltpu.VMEM((T * B, H), f32)],
    )(feat_full, ids_tm, emb_table.astype(bf16), wih0_t, wstack, wcat,
      bias, wlin_t, blin)


# --------------------------------- main -------------------------------------
if __name__ == "__main__":
    vocab_size, embed_size, hidden_size, num_layers, max_seq_length = 128, 32, 32, 2, 8
    B, seq_len = 4, 7
    T = seq_len + 1                      # feature is prepended as timestep 0
    lengths = [8, 6, 5, 3]               # sorted desc (pack_padded_sequence requirement)
    H = hidden_size

    key = jax.random.PRNGKey(0)
    ks = jax.random.split(key, 9)
    emb_table = 0.1 * jax.random.normal(ks[0], (vocab_size, embed_size), jnp.float32)
    wih = 0.1 * jax.random.normal(ks[1], (num_layers, 4 * H, embed_size), jnp.float32)
    whh = 0.1 * jax.random.normal(ks[2], (num_layers, 4 * H, H), jnp.float32)
    b_ih = 0.1 * jax.random.normal(ks[3], (num_layers, 4 * H), jnp.float32)
    b_hh = 0.1 * jax.random.normal(ks[4], (num_layers, 4 * H), jnp.float32)
    w_lin = 0.1 * jax.random.normal(ks[5], (vocab_size, H), jnp.float32)
    b_lin = 0.1 * jax.random.normal(ks[6], (vocab_size,), jnp.float32)
    captions = jax.random.randint(ks[7], (B, seq_len), 0, vocab_size, jnp.int32)
    feature = jax.random.normal(ks[8], (B, embed_size), jnp.float32)

    # pack_padded_sequence(batch_first=True) row selection (time-major packed order).
    packed_idx = jnp.asarray(
        np.array([t * B + b for t in range(T) for b in range(B) if t < lengths[b]],
                 dtype=np.int32))

    @jax.jit
    def run(captions, feature, emb_table, wih, whh, b_ih, b_hh, w_lin, b_lin, packed_idx):
        logp_full = decoder_forward(captions, feature, emb_table, wih, whh,
                                    b_ih, b_hh, w_lin, b_lin)
        # TODO(synk): packing is a row gather on the final log-probs; it commutes with
        # the row-wise Linear+LogSoftmax and the causal LSTM, so it stays wrapper-side.
        return jnp.take(logp_full, packed_idx, axis=0)

    out = jax.block_until_ready(run(captions, feature, emb_table, wih, whh,
                                    b_ih, b_hh, w_lin, b_lin, packed_idx))

    # ---- pure numpy reference check (float32) ----
    def sigmoid(z):
        return 1.0 / (1.0 + np.exp(-z))

    emb_np, cap_np, feat_np = np.asarray(emb_table), np.asarray(captions), np.asarray(feature)
    inputs = np.concatenate([feat_np[:, None, :], emb_np[cap_np]], axis=1)   # (B, T, E)
    inp = np.transpose(inputs, (1, 0, 2))                                     # (T, B, E)
    wih_n, whh_n = np.asarray(wih), np.asarray(whh)
    b_n = np.asarray(b_ih + b_hh)
    h = np.zeros((num_layers, B, H), np.float32)
    c = np.zeros((num_layers, B, H), np.float32)
    outs = np.zeros((T, B, H), np.float32)
    for t in range(T):
        x = inp[t]
        for l in range(num_layers):
            gates = x @ wih_n[l].T + h[l] @ whh_n[l].T + b_n[l]
            i = sigmoid(gates[:, 0 * H:1 * H])
            f = sigmoid(gates[:, 1 * H:2 * H])
            g = np.tanh(gates[:, 2 * H:3 * H])
            o = sigmoid(gates[:, 3 * H:4 * H])
            c[l] = f * c[l] + i * g
            h[l] = o * np.tanh(c[l])
            x = h[l]
        outs[t] = x
    packed_ref = outs.reshape(T * B, H)[np.asarray(packed_idx)]
    logits = packed_ref @ np.asarray(w_lin).T + np.asarray(b_lin)
    ref = logits - logits.max(axis=1, keepdims=True)
    ref = ref - np.log(np.exp(ref).sum(axis=1, keepdims=True))

    # bf16 matmul operands (f32 accumulation) -> looser tolerance than pure f32.
    np.testing.assert_allclose(np.asarray(out), ref, atol=2e-2, rtol=2e-2)
    print("KERNEL_OK")
</pallas_src>

<mosaic_0001>
module attributes {stable_mosaic.version = 11 : i64} {
  func.func @decoder_kernel(%arg0: memref<32x32xf32, #tpu.memory_space<vmem>>, %arg1: memref<32x1xi32, #tpu.memory_space<vmem>>, %arg2: memref<128x32xbf16, #tpu.memory_space<vmem>>, %arg3: memref<32x128xbf16, #tpu.memory_space<vmem>>, %arg4: memref<96x128xbf16, #tpu.memory_space<vmem>>, %arg5: memref<1x64x128xbf16, #tpu.memory_space<vmem>>, %arg6: memref<2x128xf32, #tpu.memory_space<vmem>>, %arg7: memref<32x128xbf16, #tpu.memory_space<vmem>>, %arg8: memref<1x128xf32, #tpu.memory_space<vmem>>, %arg9: memref<32x128xf32, #tpu.memory_space<vmem>>, %arg10: memref<32x32xf32, #tpu.memory_space<vmem>>) attributes {dimension_semantics = [], scalar_prefetch = 0 : i64, scratch_operands = 1 : i64, tpu.core_type = #tpu.core_type<tc>} {
    %c0 = arith.constant 0 : index
    %c0_0 = arith.constant 0 : index
    %0 = vector.load %arg6[%c0, %c0_0] : memref<2x128xf32, #tpu.memory_space<vmem>>, vector<2x128xf32>
    %c0_1 = arith.constant 0 : index
    %c0_2 = arith.constant 0 : index
    %1 = vector.load %arg4[%c0_1, %c0_2] : memref<96x128xbf16, #tpu.memory_space<vmem>>, vector<96x128xbf16>
    %c0_3 = arith.constant 0 : index
    %c0_4 = arith.constant 0 : index
    %2 = vector.load %arg1[%c0_3, %c0_4] : memref<32x1xi32, #tpu.memory_space<vmem>>, vector<32x1xi32>
    %3 = tpu.iota {dimensions = array<i32: 1>} : vector<32x128xi32>
    %4 = vector.broadcast %2 : vector<32x1xi32> to vector<32x128xi32>
    %5 = arith.cmpi eq, %4, %3 : vector<32x128xi32>
    %cst = arith.constant 1.000000e+00 : f32
    %cst_5 = arith.constant 0.000000e+00 : f32
    %6 = vector.broadcast %cst : f32 to vector<32x128xf32>
    %7 = vector.broadcast %cst_5 : f32 to vector<32x128xf32>
    %8 = arith.select %5, %6, %7 : vector<32x128xi1>, vector<32x128xf32>
    %9 = arith.truncf %8 : vector<32x128xf32> to vector<32x128xbf16>
    %c0_6 = arith.constant 0 : index
    %c0_7 = arith.constant 0 : index
    %10 = vector.load %arg2[%c0_6, %c0_7] : memref<128x32xbf16, #tpu.memory_space<vmem>>, vector<128x32xbf16>
    %cst_8 = arith.constant dense<0.000000e+00> : vector<32x32xf32>
    %11 = tpu.matmul %9, %10, %cst_8 {dimension_numbers = #tpu.dot_dimension_numbers<[1], [0], [0], [1], [0, 0, 1, 1], [], []>} : vector<32x128xbf16>, vector<128x32xbf16>, vector<32x32xf32> -> vector<32x32xf32>
    %c0_9 = arith.constant 0 : index
    %c0_10 = arith.constant 0 : index
    %12 = vector.load %arg0[%c0_9, %c0_10] : memref<32x32xf32, #tpu.memory_space<vmem>>, vector<32x32xf32>
    %13 = arith.addf %12, %11 : vector<32x32xf32>
    %14 = arith.truncf %13 : vector<32x32xf32> to vector<32x32xbf16>
    %c0_11 = arith.constant 0 : index
    %c0_12 = arith.constant 0 : index
    %15 = vector.load %arg3[%c0_11, %c0_12] : memref<32x128xbf16, #tpu.memory_space<vmem>>, vector<32x128xbf16>
    %cst_13 = arith.constant dense<0.000000e+00> : vector<32x128xf32>
    %16 = tpu.matmul %14, %15, %cst_13 {dimension_numbers = #tpu.dot_dimension_numbers<[1], [0], [0], [1], [0, 0, 1, 1], [], []>} : vector<32x32xbf16>, vector<32x128xbf16>, vector<32x128xf32> -> vector<32x128xf32>
    %17 = vector.extract_strided_slice %0 {offsets = [0, 0], sizes = [1, 128], strides = [1, 1]} : vector<2x128xf32> to vector<1x128xf32>
    %18 = vector.shape_cast %17 : vector<1x128xf32> to vector<1x128xf32>
    %19 = vector.broadcast %18 : vector<1x128xf32> to vector<32x128xf32>
    %20 = arith.addf %16, %19 : vector<32x128xf32>
    %cst_14 = arith.constant 0.000000e+00 : bf16
    %21 = vector.broadcast %cst_14 : bf16 to vector<4x32xbf16>
    %cst_15 = arith.constant 0.000000e+00 : f32
    %22 = vector.broadcast %cst_15 : f32 to vector<4x32xf32>
    %cst_16 = arith.constant 0.000000e+00 : f32
    %23 = vector.broadcast %cst_16 : f32 to vector<4x32xf32>
    %cst_17 = arith.constant 0.000000e+00 : f32
    %24 = vector.broadcast %cst_17 : f32 to vector<4x32xf32>
    %25 = vector.extract_strided_slice %0 {offsets = [1, 0], sizes = [1, 128], strides = [1, 1]} : vector<2x128xf32> to vector<1x128xf32>
    %26 = vector.shape_cast %25 : vector<1x128xf32> to vector<1x128xf32>
    %27 = vector.broadcast %26 : vector<1x128xf32> to vector<4x128xf32>
    %cst_18 = arith.constant 0.000000e+00 : f32
    %28 = vector.broadcast %cst_18 : f32 to vector<4x128xf32>
    %29 = vector.extract_strided_slice %20 {offsets = [0, 0], sizes = [4, 128], strides = [1, 1]} : vector<32x128xf32> to vector<4x128xf32>
    %30 = arith.addf %29, %28 : vector<4x128xf32>
    %31 = arith.negf %30 : vector<4x128xf32>
    %32 = math.exp %31 : vector<4x128xf32>
    %cst_19 = arith.constant 1.000000e+00 : f32
    %33 = vector.broadcast %cst_19 : f32 to vector<4x128xf32>
    %34 = arith.addf %33, %32 : vector<4x128xf32>
    %35 = arith.divf %33, %34 : vector<4x128xf32>
    %36 = vector.extract_strided_slice %35 {offsets = [0, 0], sizes = [4, 32], strides = [1, 1]} : vector<4x128xf32> to vector<4x32xf32>
    %37 = vector.extract_strided_slice %35 {offsets = [0, 32], sizes = [4, 32], strides = [1, 1]} : vector<4x128xf32> to vector<4x32xf32>
    %38 = vector.extract_strided_slice %35 {offsets = [0, 64], sizes = [4, 32], strides = [1, 1]} : vector<4x128xf32> to vector<4x32xf32>
    %cst_20 = arith.constant 2.000000e+00 : f32
    %39 = vector.broadcast %cst_20 : f32 to vector<4x32xf32>
    %40 = arith.mulf %39, %38 : vector<4x32xf32>
    %cst_21 = arith.constant 1.000000e+00 : f32
    %41 = vector.broadcast %cst_21 : f32 to vector<4x32xf32>
    %42 = arith.subf %40, %41 : vector<4x32xf32>
    %43 = vector.extract_strided_slice %35 {offsets = [0, 96], sizes = [4, 32], strides = [1, 1]} : vector<4x128xf32> to vector<4x32xf32>
    %44 = arith.mulf %37, %23 : vector<4x32xf32>
    %45 = arith.mulf %36, %42 : vector<4x32xf32>
    %46 = arith.addf %44, %45 : vector<4x32xf32>
    %47 = math.tanh %46 : vector<4x32xf32>
    %48 = arith.mulf %43, %47 : vector<4x32xf32>
    %49 = arith.truncf %48 : vector<4x32xf32> to vector<4x32xbf16>
    %50 = tpu.concatenate %49, %21, %21 in 1 : vector<4x32xbf16>, vector<4x32xbf16>, vector<4x32xbf16> -> vector<4x96xbf16>
    %51 = arith.truncf %22 : vector<4x32xf32> to vector<4x32xbf16>
    %52 = tpu.concatenate %21, %49, %51 in 1 : vector<4x32xbf16>, vector<4x32xbf16>, vector<4x32xbf16> -> vector<4x96xbf16>
    %53 = tpu.concatenate %50, %52 in 0 : vector<4x96xbf16>, vector<4x96xbf16> -> vector<8x96xbf16>
    %cst_22 = arith.constant dense<0.000000e+00> : vector<8x128xf32>
    %54 = tpu.matmul %53, %1, %cst_22 {dimension_numbers = #tpu.dot_dimension_numbers<[1], [0], [0], [1], [0, 0, 1, 1], [], []>} : vector<8x96xbf16>, vector<96x128xbf16>, vector<8x128xf32> -> vector<8x128xf32>
    %55 = vector.extract_strided_slice %54 {offsets = [0, 0], sizes = [4, 128], strides = [1, 1]} : vector<8x128xf32> to vector<4x128xf32>
    %56 = vector.extract_strided_slice %54 {offsets = [4, 0], sizes = [4, 128], strides = [1, 1]} : vector<8x128xf32> to vector<4x128xf32>
    %57 = arith.addf %56, %27 : vector<4x128xf32>
    %58 = arith.negf %57 : vector<4x128xf32>
    %59 = math.exp %58 : vector<4x128xf32>
    %cst_23 = arith.constant 1.000000e+00 : f32
    %60 = vector.broadcast %cst_23 : f32 to vector<4x128xf32>
    %61 = arith.addf %60, %59 : vector<4x128xf32>
    %62 = arith.divf %60, %61 : vector<4x128xf32>
    %63 = vector.extract_strided_slice %62 {offsets = [0, 0], sizes = [4, 32], strides = [1, 1]} : vector<4x128xf32> to vector<4x32xf32>
    %64 = vector.extract_strided_slice %62 {offsets = [0, 32], sizes = [4, 32], strides = [1, 1]} : vector<4x128xf32> to vector<4x32xf32>
    %65 = vector.extract_strided_slice %62 {offsets = [0, 64], sizes = [4, 32], strides = [1, 1]} : vector<4x128xf32> to vector<4x32xf32>
    %cst_24 = arith.constant 2.000000e+00 : f32
    %66 = vector.broadcast %cst_24 : f32 to vector<4x32xf32>
    %67 = arith.mulf %66, %65 : vector<4x32xf32>
    %cst_25 = arith.constant 1.000000e+00 : f32
    %68 = vector.broadcast %cst_25 : f32 to vector<4x32xf32>
    %69 = arith.subf %67, %68 : vector<4x32xf32>
    %70 = vector.extract_strided_slice %62 {offsets = [0, 96], sizes = [4, 32], strides = [1, 1]} : vector<4x128xf32> to vector<4x32xf32>
    %71 = arith.mulf %64, %24 : vector<4x32xf32>
    %72 = arith.mulf %63, %69 : vector<4x32xf32>
    %73 = arith.addf %71, %72 : vector<4x32xf32>
    %74 = math.tanh %73 : vector<4x32xf32>
    %75 = arith.mulf %70, %74 : vector<4x32xf32>
    %c0_26 = arith.constant 0 : index
    %c0_27 = arith.constant 0 : index
    %76 = vector.load %arg10[%c0_26, %c0_27] : memref<32x32xf32, #tpu.memory_space<vmem>>, vector<4x32xf32>
    tpu.vector_store %arg10[%c0_26, %c0_27], %75 {strides = array<i32>} : memref<32x32xf32, #tpu.memory_space<vmem>>, vector<4x32xf32>,
    %77 = vector.extract_strided_slice %20 {offsets = [4, 0], sizes = [4, 128], strides = [1, 1]} : vector<32x128xf32> to vector<4x128xf32>
    %78 = arith.addf %77, %55 : vector<4x128xf32>
    %79 = arith.negf %78 : vector<4x128xf32>
    %80 = math.exp %79 : vector<4x128xf32>
    %cst_28 = arith.constant 1.000000e+00 : f32
    %81 = vector.broadcast %cst_28 : f32 to vector<4x128xf32>
    %82 = arith.addf %81, %80 : vector<4x128xf32>
    %83 = arith.divf %81, %82 : vector<4x128xf32>
    %84 = vector.extract_strided_slice %83 {offsets = [0, 0], sizes = [4, 32], strides = [1, 1]} : vector<4x128xf32> to vector<4x32xf32>
    %85 = vector.extract_strided_slice %83 {offsets = [0, 32], sizes = [4, 32], strides = [1, 1]} : vector<4x128xf32> to vector<4x32xf32>
    %86 = vector.extract_strided_slice %83 {offsets = [0, 64], sizes = [4, 32], strides = [1, 1]} : vector<4x128xf32> to vector<4x32xf32>
    %cst_29 = arith.constant 2.000000e+00 : f32
    %87 = vector.broadcast %cst_29 : f32 to vector<4x32xf32>
    %88 = arith.mulf %87, %86 : vector<4x32xf32>
    %cst_30 = arith.constant 1.000000e+00 : f32
    %89 = vector.broadcast %cst_30 : f32 to vector<4x32xf32>
    %90 = arith.subf %88, %89 : vector<4x32xf32>
    %91 = vector.extract_strided_slice %83 {offsets = [0, 96], sizes = [4, 32], strides = [1, 1]} : vector<4x128xf32> to vector<4x32xf32>
    %92 = arith.mulf %85, %46 : vector<4x32xf32>
    %93 = arith.mulf %84, %90 : vector<4x32xf32>
    %94 = arith.addf %92, %93 : vector<4x32xf32>
    %95 = math.tanh %94 : vector<4x32xf32>
    %96 = arith.mulf %91, %95 : vector<4x32xf32>
    %97 = arith.truncf %96 : vector<4x32xf32> to vector<4x32xbf16>
    %98 = tpu.concatenate %97, %21, %21 in 1 : vector<4x32xbf16>, vector<4x32xbf16>, vector<4x32xbf16> -> vector<4x96xbf16>
    %99 = arith.truncf %75 : vector<4x32xf32> to vector<4x32xbf16>
    %100 = tpu.concatenate %21, %97, %99 in 1 : vector<4x32xbf16>, vector<4x32xbf16>, vector<4x32xbf16> -> vector<4x96xbf16>
    %101 = tpu.concatenate %98, %100 in 0 : vector<4x96xbf16>, vector<4x96xbf16> -> vector<8x96xbf16>
    %cst_31 = arith.constant dense<0.000000e+00> : vector<8x128xf32>
    %102 = tpu.matmul %101, %1, %cst_31 {dimension_numbers = #tpu.dot_dimension_numbers<[1], [0], [0], [1], [0, 0, 1, 1], [], []>} : vector<8x96xbf16>, vector<96x128xbf16>, vector<8x128xf32> -> vector<8x128xf32>
    %103 = vector.extract_strided_slice %102 {offsets = [0, 0], sizes = [4, 128], strides = [1, 1]} : vector<8x128xf32> to vector<4x128xf32>
    %104 = vector.extract_strided_slice %102 {offsets = [4, 0], sizes = [4, 128], strides = [1, 1]} : vector<8x128xf32> to vector<4x128xf32>
    %105 = arith.addf %104, %27 : vector<4x128xf32>
    %106 = arith.negf %105 : vector<4x128xf32>
    %107 = math.exp %106 : vector<4x128xf32>
    %cst_32 = arith.constant 1.000000e+00 : f32
    %108 = vector.broadcast %cst_32 : f32 to vector<4x128xf32>
    %109 = arith.addf %108, %107 : vector<4x128xf32>
    %110 = arith.divf %108, %109 : vector<4x128xf32>
    %111 = vector.extract_strided_slice %110 {offsets = [0, 0], sizes = [4, 32], strides = [1, 1]} : vector<4x128xf32> to vector<4x32xf32>
    %112 = vector.extract_strided_slice %110 {offsets = [0, 32], sizes = [4, 32], strides = [1, 1]} : vector<4x128xf32> to vector<4x32xf32>
    %113 = vector.extract_strided_slice %110 {offsets = [0, 64], sizes = [4, 32], strides = [1, 1]} : vector<4x128xf32> to vector<4x32xf32>
    %cst_33 = arith.constant 2.000000e+00 : f32
    %114 = vector.broadcast %cst_33 : f32 to vector<4x32xf32>
    %115 = arith.mulf %114, %113 : vector<4x32xf32>
    %cst_34 = arith.constant 1.000000e+00 : f32
    %116 = vector.broadcast %cst_34 : f32 to vector<4x32xf32>
    %117 = arith.subf %115, %116 : vector<4x32xf32>
    %118 = vector.extract_strided_slice %110 {offsets = [0, 96], sizes = [4, 32], strides = [1, 1]} : vector<4x128xf32> to vector<4x32xf32>
    %119 = arith.mulf %112, %73 : vector<4x32xf32>
    %120 = arith.mulf %111, %117 : vector<4x32xf32>
    %121 = arith.addf %119, %120 : vector<4x32xf32>
    %122 = math.tanh %121 : vector<4x32xf32>
    %123 = arith.mulf %118, %122 : vector<4x32xf32>
    %c4 = arith.constant 4 : index
    %c0_35 = arith.constant 0 : index
    %124 = vector.load %arg10[%c4, %c0_35] : memref<32x32xf32, #tpu.memory_space<vmem>>, vector<4x32xf32>
    tpu.vector_store %arg10[%c4, %c0_35], %123 {strides = array<i32>} : memref<32x32xf32, #tpu.memory_space<vmem>>, vector<4x32xf32>,
    %125 = vector.extract_strided_slice %20 {offsets = [8, 0], sizes = [4, 128], strides = [1, 1]} : vector<32x128xf32> to vector<4x128xf32>
    %126 = arith.addf %125, %103 : vector<4x128xf32>
    %127 = arith.negf %126 : vector<4x128xf32>
    %128 = math.exp %127 : vector<4x128xf32>
    %cst_36 = arith.constant 1.000000e+00 : f32
    %129 = vector.broadcast %cst_36 : f32 to vector<4x128xf32>
    %130 = arith.addf %129, %128 : vector<4x128xf32>
    %131 = arith.divf %129, %130 : vector<4x128xf32>
    %132 = vector.extract_strided_slice %131 {offsets = [0, 0], sizes = [4, 32], strides = [1, 1]} : vector<4x128xf32> to vector<4x32xf32>
    %133 = vector.extract_strided_slice %131 {offsets = [0, 32], sizes = [4, 32], strides = [1, 1]} : vector<4x128xf32> to vector<4x32xf32>
    %134 = vector.extract_strided_slice %131 {offsets = [0, 64], sizes = [4, 32], strides = [1, 1]} : vector<4x128xf32> to vector<4x32xf32>
    %cst_37 = arith.constant 2.000000e+00 : f32
    %135 = vector.broadcast %cst_37 : f32 to vector<4x32xf32>
    %136 = arith.mulf %135, %134 : vector<4x32xf32>
    %cst_38 = arith.constant 1.000000e+00 : f32
    %137 = vector.broadcast %cst_38 : f32 to vector<4x32xf32>
    %138 = arith.subf %136, %137 : vector<4x32xf32>
    %139 = vector.extract_strided_slice %131 {offsets = [0, 96], sizes = [4, 32], strides = [1, 1]} : vector<4x128xf32> to vector<4x32xf32>
    %140 = arith.mulf %133, %94 : vector<4x32xf32>
    %141 = arith.mulf %132, %138 : vector<4x32xf32>
    %142 = arith.addf %140, %141 : vector<4x32xf32>
    %143 = math.tanh %142 : vector<4x32xf32>
    %144 = arith.mulf %139, %143 : vector<4x32xf32>
    %145 = arith.truncf %144 : vector<4x32xf32> to vector<4x32xbf16>
    %146 = tpu.concatenate %145, %21, %21 in 1 : vector<4x32xbf16>, vector<4x32xbf16>, vector<4x32xbf16> -> vector<4x96xbf16>
    %147 = arith.truncf %123 : vector<4x32xf32> to vector<4x32xbf16>
    %148 = tpu.concatenate %21, %145, %147 in 1 : vector<4x32xbf16>, vector<4x32xbf16>, vector<4x32xbf16> -> vector<4x96xbf16>
    %149 = tpu.concatenate %146, %148 in 0 : vector<4x96xbf16>, vector<4x96xbf16> -> vector<8x96xbf16>
    %cst_39 = arith.constant dense<0.000000e+00> : vector<8x128xf32>
    %150 = tpu.matmul %149, %1, %cst_39 {dimension_numbers = #tpu.dot_dimension_numbers<[1], [0], [0], [1], [0, 0, 1, 1], [], []>} : vector<8x96xbf16>, vector<96x128xbf16>, vector<8x128xf32> -> vector<8x128xf32>
    %151 = vector.extract_strided_slice %150 {offsets = [0, 0], sizes = [4, 128], strides = [1, 1]} : vector<8x128xf32> to vector<4x128xf32>
    %152 = vector.extract_strided_slice %150 {offsets = [4, 0], sizes = [4, 128], strides = [1, 1]} : vector<8x128xf32> to vector<4x128xf32>
    %153 = arith.addf %152, %27 : vector<4x128xf32>
    %154 = arith.negf %153 : vector<4x128xf32>
    %155 = math.exp %154 : vector<4x128xf32>
    %cst_40 = arith.constant 1.000000e+00 : f32
    %156 = vector.broadcast %cst_40 : f32 to vector<4x128xf32>
    %157 = arith.addf %156, %155 : vector<4x128xf32>
    %158 = arith.divf %156, %157 : vector<4x128xf32>
    %159 = vector.extract_strided_slice %158 {offsets = [0, 0], sizes = [4, 32], strides = [1, 1]} : vector<4x128xf32> to vector<4x32xf32>
    %160 = vector.extract_strided_slice %158 {offsets = [0, 32], sizes = [4, 32], strides = [1, 1]} : vector<4x128xf32> to vector<4x32xf32>
    %161 = vector.extract_strided_slice %158 {offsets = [0, 64], sizes = [4, 32], strides = [1, 1]} : vector<4x128xf32> to vector<4x32xf32>
    %cst_41 = arith.constant 2.000000e+00 : f32
    %162 = vector.broadcast %cst_41 : f32 to vector<4x32xf32>
    %163 = arith.mulf %162, %161 : vector<4x32xf32>
    %cst_42 = arith.constant 1.000000e+00 : f32
    %164 = vector.broadcast %cst_42 : f32 to vector<4x32xf32>
    %165 = arith.subf %163, %164 : vector<4x32xf32>
    %166 = vector.extract_strided_slice %158 {offsets = [0, 96], sizes = [4, 32], strides = [1, 1]} : vector<4x128xf32> to vector<4x32xf32>
    %167 = arith.mulf %160, %121 : vector<4x32xf32>
    %168 = arith.mulf %159, %165 : vector<4x32xf32>
    %169 = arith.addf %167, %168 : vector<4x32xf32>
    %170 = math.tanh %169 : vector<4x32xf32>
    %171 = arith.mulf %166, %170 : vector<4x32xf32>
    %c8 = arith.constant 8 : index
    %c0_43 = arith.constant 0 : index
    %172 = vector.load %arg10[%c8, %c0_43] : memref<32x32xf32, #tpu.memory_space<vmem>>, vector<4x32xf32>
    tpu.vector_store %arg10[%c8, %c0_43], %171 {strides = array<i32>} : memref<32x32xf32, #tpu.memory_space<vmem>>, vector<4x32xf32>,
    %173 = vector.extract_strided_slice %20 {offsets = [12, 0], sizes = [4, 128], strides = [1, 1]} : vector<32x128xf32> to vector<4x128xf32>
    %174 = arith.addf %173, %151 : vector<4x128xf32>
    %175 = arith.negf %174 : vector<4x128xf32>
    %176 = math.exp %175 : vector<4x128xf32>
    %cst_44 = arith.constant 1.000000e+00 : f32
    %177 = vector.broadcast %cst_44 : f32 to vector<4x128xf32>
    %178 = arith.addf %177, %176 : vector<4x128xf32>
    %179 = arith.divf %177, %178 : vector<4x128xf32>
    %180 = vector.extract_strided_slice %179 {offsets = [0, 0], sizes = [4, 32], strides = [1, 1]} : vector<4x128xf32> to vector<4x32xf32>
    %181 = vector.extract_strided_slice %179 {offsets = [0, 32], sizes = [4, 32], strides = [1, 1]} : vector<4x128xf32> to vector<4x32xf32>
    %182 = vector.extract_strided_slice %179 {offsets = [0, 64], sizes = [4, 32], strides = [1, 1]} : vector<4x128xf32> to vector<4x32xf32>
    %cst_45 = arith.constant 2.000000e+00 : f32
    %183 = vector.broadcast %cst_45 : f32 to vector<4x32xf32>
    %184 = arith.mulf %183, %182 : vector<4x32xf32>
    %cst_46 = arith.constant 1.000000e+00 : f32
    %185 = vector.broadcast %cst_46 : f32 to vector<4x32xf32>
    %186 = arith.subf %184, %185 : vector<4x32xf32>
    %187 = vector.extract_strided_slice %179 {offsets = [0, 96], sizes = [4, 32], strides = [1, 1]} : vector<4x128xf32> to vector<4x32xf32>
    %188 = arith.mulf %181, %142 : vector<4x32xf32>
    %189 = arith.mulf %180, %186 : vector<4x32xf32>
    %190 = arith.addf %188, %189 : vector<4x32xf32>
    %191 = math.tanh %190 : vector<4x32xf32>
    %192 = arith.mulf %187, %191 : vector<4x32xf32>
    %193 = arith.truncf %192 : vector<4x32xf32> to vector<4x32xbf16>
    %194 = tpu.concatenate %193, %21, %21 in 1 : vector<4x32xbf16>, vector<4x32xbf16>, vector<4x32xbf16> -> vector<4x96xbf16>
    %195 = arith.truncf %171 : vector<4x32xf32> to vector<4x32xbf16>
    %196 = tpu.concatenate %21, %193, %195 in 1 : vector<4x32xbf16>, vector<4x32xbf16>, vector<4x32xbf16> -> vector<4x96xbf16>
    %197 = tpu.concatenate %194, %196 in 0 : vector<4x96xbf16>, vector<4x96xbf16> -> vector<8x96xbf16>
    %cst_47 = arith.constant dense<0.000000e+00> : vector<8x128xf32>
    %198 = tpu.matmul %197, %1, %cst_47 {dimension_numbers = #tpu.dot_dimension_numbers<[1], [0], [0], [1], [0, 0, 1, 1], [], []>} : vector<8x96xbf16>, vector<96x128xbf16>, vector<8x128xf32> -> vector<8x128xf32>
    %199 = vector.extract_strided_slice %198 {offsets = [0, 0], sizes = [4, 128], strides = [1, 1]} : vector<8x128xf32> to vector<4x128xf32>
    %200 = vector.extract_strided_slice %198 {offsets = [4, 0], sizes = [4, 128], strides = [1, 1]} : vector<8x128xf32> to vector<4x128xf32>
    %201 = arith.addf %200, %27 : vector<4x128xf32>
    %202 = arith.negf %201 : vector<4x128xf32>
    %203 = math.exp %202 : vector<4x128xf32>
    %cst_48 = arith.constant 1.000000e+00 : f32
    %204 = vector.broadcast %cst_48 : f32 to vector<4x128xf32>
    %205 = arith.addf %204, %203 : vector<4x128xf32>
    %206 = arith.divf %204, %205 : vector<4x128xf32>
    %207 = vector.extract_strided_slice %206 {offsets = [0, 0], sizes = [4, 32], strides = [1, 1]} : vector<4x128xf32> to vector<4x32xf32>
    %208 = vector.extract_strided_slice %206 {offsets = [0, 32], sizes = [4, 32], strides = [1, 1]} : vector<4x128xf32> to vector<4x32xf32>
    %209 = vector.extract_strided_slice %206 {offsets = [0, 64], sizes = [4, 32], strides = [1, 1]} : vector<4x128xf32> to vector<4x32xf32>
    %cst_49 = arith.constant 2.000000e+00 : f32
    %210 = vector.broadcast %cst_49 : f32 to vector<4x32xf32>
    %211 = arith.mulf %210, %209 : vector<4x32xf32>
    %cst_50 = arith.constant 1.000000e+00 : f32
    %212 = vector.broadcast %cst_50 : f32 to vector<4x32xf32>
    %213 = arith.subf %211, %212 : vector<4x32xf32>
    %214 = vector.extract_strided_slice %206 {offsets = [0, 96], sizes = [4, 32], strides = [1, 1]} : vector<4x128xf32> to vector<4x32xf32>
    %215 = arith.mulf %208, %169 : vector<4x32xf32>
    %216 = arith.mulf %207, %213 : vector<4x32xf32>
    %217 = arith.addf %215, %216 : vector<4x32xf32>
    %218 = math.tanh %217 : vector<4x32xf32>
    %219 = arith.mulf %214, %218 : vector<4x32xf32>
    %c12 = arith.constant 12 : index
    %c0_51 = arith.constant 0 : index
    %220 = vector.load %arg10[%c12, %c0_51] : memref<32x32xf32, #tpu.memory_space<vmem>>, vector<4x32xf32>
    tpu.vector_store %arg10[%c12, %c0_51], %219 {strides = array<i32>} : memref<32x32xf32, #tpu.memory_space<vmem>>, vector<4x32xf32>,
    %221 = vector.extract_strided_slice %20 {offsets = [16, 0], sizes = [4, 128], strides = [1, 1]} : vector<32x128xf32> to vector<4x128xf32>
    %222 = arith.addf %221, %199 : vector<4x128xf32>
    %223 = arith.negf %222 : vector<4x128xf32>
    %224 = math.exp %223 : vector<4x128xf32>
    %cst_52 = arith.constant 1.000000e+00 : f32
    %225 = vector.broadcast %cst_52 : f32 to vector<4x128xf32>
    %226 = arith.addf %225, %224 : vector<4x128xf32>
    %227 = arith.divf %225, %226 : vector<4x128xf32>
    %228 = vector.extract_strided_slice %227 {offsets = [0, 0], sizes = [4, 32], strides = [1, 1]} : vector<4x128xf32> to vector<4x32xf32>
    %229 = vector.extract_strided_slice %227 {offsets = [0, 32], sizes = [4, 32], strides = [1, 1]} : vector<4x128xf32> to vector<4x32xf32>
    %230 = vector.extract_strided_slice %227 {offsets = [0, 64], sizes = [4, 32], strides = [1, 1]} : vector<4x128xf32> to vector<4x32xf32>
    %cst_53 = arith.constant 2.000000e+00 : f32
    %231 = vector.broadcast %cst_53 : f32 to vector<4x32xf32>
    %232 = arith.mulf %231, %230 : vector<4x32xf32>
    %cst_54 = arith.constant 1.000000e+00 : f32
    %233 = vector.broadcast %cst_54 : f32 to vector<4x32xf32>
    %234 = arith.subf %232, %233 : vector<4x32xf32>
    %235 = vector.extract_strided_slice %227 {offsets = [0, 96], sizes = [4, 32], strides = [1, 1]} : vector<4x128xf32> to vector<4x32xf32>
    %236 = arith.mulf %229, %190 : vector<4x32xf32>
    %237 = arith.mulf %228, %234 : vector<4x32xf32>
    %238 = arith.addf %236, %237 : vector<4x32xf32>
    %239 = math.tanh %238 : vector<4x32xf32>
    %240 = arith.mulf %235, %239 : vector<4x32xf32>
    %241 = arith.truncf %240 : vector<4x32xf32> to vector<4x32xbf16>
    %242 = tpu.concatenate %241, %21, %21 in 1 : vector<4x32xbf16>, vector<4x32xbf16>, vector<4x32xbf16> -> vector<4x96xbf16>
    %243 = arith.truncf %219 : vector<4x32xf32> to vector<4x32xbf16>
    %244 = tpu.concatenate %21, %241, %243 in 1 : vector<4x32xbf16>, vector<4x32xbf16>, vector<4x32xbf16> -> vector<4x96xbf16>
    %245 = tpu.concatenate %242, %244 in 0 : vector<4x96xbf16>, vector<4x96xbf16> -> vector<8x96xbf16>
    %cst_55 = arith.constant dense<0.000000e+00> : vector<8x128xf32>
    %246 = tpu.matmul %245, %1, %cst_55 {dimension_numbers = #tpu.dot_dimension_numbers<[1], [0], [0], [1], [0, 0, 1, 1], [], []>} : vector<8x96xbf16>, vector<96x128xbf16>, vector<8x128xf32> -> vector<8x128xf32>
    %247 = vector.extract_strided_slice %246 {offsets = [0, 0], sizes = [4, 128], strides = [1, 1]} : vector<8x128xf32> to vector<4x128xf32>
    %248 = vector.extract_strided_slice %246 {offsets = [4, 0], sizes = [4, 128], strides = [1, 1]} : vector<8x128xf32> to vector<4x128xf32>
    %249 = arith.addf %248, %27 : vector<4x128xf32>
    %250 = arith.negf %249 : vector<4x128xf32>
    %251 = math.exp %250 : vector<4x128xf32>
    %cst_56 = arith.constant 1.000000e+00 : f32
    %252 = vector.broadcast %cst_56 : f32 to vector<4x128xf32>
    %253 = arith.addf %252, %251 : vector<4x128xf32>
    %254 = arith.divf %252, %253 : vector<4x128xf32>
    %255 = vector.extract_strided_slice %254 {offsets = [0, 0], sizes = [4, 32], strides = [1, 1]} : vector<4x128xf32> to vector<4x32xf32>
    %256 = vector.extract_strided_slice %254 {offsets = [0, 32], sizes = [4, 32], strides = [1, 1]} : vector<4x128xf32> to vector<4x32xf32>
    %257 = vector.extract_strided_slice %254 {offsets = [0, 64], sizes = [4, 32], strides = [1, 1]} : vector<4x128xf32> to vector<4x32xf32>
    %cst_57 = arith.constant 2.000000e+00 : f32
    %258 = vector.broadcast %cst_57 : f32 to vector<4x32xf32>
    %259 = arith.mulf %258, %257 : vector<4x32xf32>
    %cst_58 = arith.constant 1.000000e+00 : f32
    %260 = vector.broadcast %cst_58 : f32 to vector<4x32xf32>
    %261 = arith.subf %259, %260 : vector<4x32xf32>
    %262 = vector.extract_strided_slice %254 {offsets = [0, 96], sizes = [4, 32], strides = [1, 1]} : vector<4x128xf32> to vector<4x32xf32>
    %263 = arith.mulf %256, %217 : vector<4x32xf32>
    %264 = arith.mulf %255, %261 : vector<4x32xf32>
    %265 = arith.addf %263, %264 : vector<4x32xf32>
    %266 = math.tanh %265 : vector<4x32xf32>
    %267 = arith.mulf %262, %266 : vector<4x32xf32>
    %c16 = arith.constant 16 : index
    %c0_59 = arith.constant 0 : index
    %268 = vector.load %arg10[%c16, %c0_59] : memref<32x32xf32, #tpu.memory_space<vmem>>, vector<4x32xf32>
    tpu.vector_store %arg10[%c16, %c0_59], %267 {strides = array<i32>} : memref<32x32xf32, #tpu.memory_space<vmem>>, vector<4x32xf32>,
    %269 = vector.extract_strided_slice %20 {offsets = [20, 0], sizes = [4, 128], strides = [1, 1]} : vector<32x128xf32> to vector<4x128xf32>
    %270 = arith.addf %269, %247 : vector<4x128xf32>
    %271 = arith.negf %270 : vector<4x128xf32>
    %272 = math.exp %271 : vector<4x128xf32>
    %cst_60 = arith.constant 1.000000e+00 : f32
    %273 = vector.broadcast %cst_60 : f32 to vector<4x128xf32>
    %274 = arith.addf %273, %272 : vector<4x128xf32>
    %275 = arith.divf %273, %274 : vector<4x128xf32>
    %276 = vector.extract_strided_slice %275 {offsets = [0, 0], sizes = [4, 32], strides = [1, 1]} : vector<4x128xf32> to vector<4x32xf32>
    %277 = vector.extract_strided_slice %275 {offsets = [0, 32], sizes = [4, 32], strides = [1, 1]} : vector<4x128xf32> to vector<4x32xf32>
    %278 = vector.extract_strided_slice %275 {offsets = [0, 64], sizes = [4, 32], strides = [1, 1]} : vector<4x128xf32> to vector<4x32xf32>
    %cst_61 = arith.constant 2.000000e+00 : f32
    %279 = vector.broadcast %cst_61 : f32 to vector<4x32xf32>
    %280 = arith.mulf %279, %278 : vector<4x32xf32>
    %cst_62 = arith.constant 1.000000e+00 : f32
    %281 = vector.broadcast %cst_62 : f32 to vector<4x32xf32>
    %282 = arith.subf %280, %281 : vector<4x32xf32>
    %283 = vector.extract_strided_slice %275 {offsets = [0, 96], sizes = [4, 32], strides = [1, 1]} : vector<4x128xf32> to vector<4x32xf32>
    %284 = arith.mulf %277, %238 : vector<4x32xf32>
    %285 = arith.mulf %276, %282 : vector<4x32xf32>
    %286 = arith.addf %284, %285 : vector<4x32xf32>
    %287 = math.tanh %286 : vector<4x32xf32>
    %288 = arith.mulf %283, %287 : vector<4x32xf32>
    %289 = arith.truncf %288 : vector<4x32xf32> to vector<4x32xbf16>
    %290 = tpu.concatenate %289, %21, %21 in 1 : vector<4x32xbf16>, vector<4x32xbf16>, vector<4x32xbf16> -> vector<4x96xbf16>
    %291 = arith.truncf %267 : vector<4x32xf32> to vector<4x32xbf16>
    %292 = tpu.concatenate %21, %289, %291 in 1 : vector<4x32xbf16>, vector<4x32xbf16>, vector<4x32xbf16> -> vector<4x96xbf16>
    %293 = tpu.concatenate %290, %292 in 0 : vector<4x96xbf16>, vector<4x96xbf16> -> vector<8x96xbf16>
    %cst_63 = arith.constant dense<0.000000e+00> : vector<8x128xf32>
    %294 = tpu.matmul %293, %1, %cst_63 {dimension_numbers = #tpu.dot_dimension_numbers<[1], [0], [0], [1], [0, 0, 1, 1], [], []>} : vector<8x96xbf16>, vector<96x128xbf16>, vector<8x128xf32> -> vector<8x128xf32>
    %295 = vector.extract_strided_slice %294 {offsets = [0, 0], sizes = [4, 128], strides = [1, 1]} : vector<8x128xf32> to vector<4x128xf32>
    %296 = vector.extract_strided_slice %294 {offsets = [4, 0], sizes = [4, 128], strides = [1, 1]} : vector<8x128xf32> to vector<4x128xf32>
    %297 = arith.addf %296, %27 : vector<4x128xf32>
    %298 = arith.negf %297 : vector<4x128xf32>
    %299 = math.exp %298 : vector<4x128xf32>
    %cst_64 = arith.constant 1.000000e+00 : f32
    %300 = vector.broadcast %cst_64 : f32 to vector<4x128xf32>
    %301 = arith.addf %300, %299 : vector<4x128xf32>
    %302 = arith.divf %300, %301 : vector<4x128xf32>
    %303 = vector.extract_strided_slice %302 {offsets = [0, 0], sizes = [4, 32], strides = [1, 1]} : vector<4x128xf32> to vector<4x32xf32>
    %304 = vector.extract_strided_slice %302 {offsets = [0, 32], sizes = [4, 32], strides = [1, 1]} : vector<4x128xf32> to vector<4x32xf32>
    %305 = vector.extract_strided_slice %302 {offsets = [0, 64], sizes = [4, 32], strides = [1, 1]} : vector<4x128xf32> to vector<4x32xf32>
    %cst_65 = arith.constant 2.000000e+00 : f32
    %306 = vector.broadcast %cst_65 : f32 to vector<4x32xf32>
    %307 = arith.mulf %306, %305 : vector<4x32xf32>
    %cst_66 = arith.constant 1.000000e+00 : f32
    %308 = vector.broadcast %cst_66 : f32 to vector<4x32xf32>
    %309 = arith.subf %307, %308 : vector<4x32xf32>
    %310 = vector.extract_strided_slice %302 {offsets = [0, 96], sizes = [4, 32], strides = [1, 1]} : vector<4x128xf32> to vector<4x32xf32>
    %311 = arith.mulf %304, %265 : vector<4x32xf32>
    %312 = arith.mulf %303, %309 : vector<4x32xf32>
    %313 = arith.addf %311, %312 : vector<4x32xf32>
    %314 = math.tanh %313 : vector<4x32xf32>
    %315 = arith.mulf %310, %314 : vector<4x32xf32>
    %c20 = arith.constant 20 : index
    %c0_67 = arith.constant 0 : index
    %316 = vector.load %arg10[%c20, %c0_67] : memref<32x32xf32, #tpu.memory_space<vmem>>, vector<4x32xf32>
    tpu.vector_store %arg10[%c20, %c0_67], %315 {strides = array<i32>} : memref<32x32xf32, #tpu.memory_space<vmem>>, vector<4x32xf32>,
    %317 = vector.extract_strided_slice %20 {offsets = [24, 0], sizes = [4, 128], strides = [1, 1]} : vector<32x128xf32> to vector<4x128xf32>
    %318 = arith.addf %317, %295 : vector<4x128xf32>
    %319 = arith.negf %318 : vector<4x128xf32>
    %320 = math.exp %319 : vector<4x128xf32>
    %cst_68 = arith.constant 1.000000e+00 : f32
    %321 = vector.broadcast %cst_68 : f32 to vector<4x128xf32>
    %322 = arith.addf %321, %320 : vector<4x128xf32>
    %323 = arith.divf %321, %322 : vector<4x128xf32>
    %324 = vector.extract_strided_slice %323 {offsets = [0, 0], sizes = [4, 32], strides = [1, 1]} : vector<4x128xf32> to vector<4x32xf32>
    %325 = vector.extract_strided_slice %323 {offsets = [0, 32], sizes = [4, 32], strides = [1, 1]} : vector<4x128xf32> to vector<4x32xf32>
    %326 = vector.extract_strided_slice %323 {offsets = [0, 64], sizes = [4, 32], strides = [1, 1]} : vector<4x128xf32> to vector<4x32xf32>
    %cst_69 = arith.constant 2.000000e+00 : f32
    %327 = vector.broadcast %cst_69 : f32 to vector<4x32xf32>
    %328 = arith.mulf %327, %326 : vector<4x32xf32>
    %cst_70 = arith.constant 1.000000e+00 : f32
    %329 = vector.broadcast %cst_70 : f32 to vector<4x32xf32>
    %330 = arith.subf %328, %329 : vector<4x32xf32>
    %331 = vector.extract_strided_slice %323 {offsets = [0, 96], sizes = [4, 32], strides = [1, 1]} : vector<4x128xf32> to vector<4x32xf32>
    %332 = arith.mulf %325, %286 : vector<4x32xf32>
    %333 = arith.mulf %324, %330 : vector<4x32xf32>
    %334 = arith.addf %332, %333 : vector<4x32xf32>
    %335 = math.tanh %334 : vector<4x32xf32>
    %336 = arith.mulf %331, %335 : vector<4x32xf32>
    %337 = arith.truncf %336 : vector<4x32xf32> to vector<4x32xbf16>
    %338 = tpu.concatenate %337, %21, %21 in 1 : vector<4x32xbf16>, vector<4x32xbf16>, vector<4x32xbf16> -> vector<4x96xbf16>
    %339 = arith.truncf %315 : vector<4x32xf32> to vector<4x32xbf16>
    %340 = tpu.concatenate %21, %337, %339 in 1 : vector<4x32xbf16>, vector<4x32xbf16>, vector<4x32xbf16> -> vector<4x96xbf16>
    %341 = tpu.concatenate %338, %340 in 0 : vector<4x96xbf16>, vector<4x96xbf16> -> vector<8x96xbf16>
    %cst_71 = arith.constant dense<0.000000e+00> : vector<8x128xf32>
    %342 = tpu.matmul %341, %1, %cst_71 {dimension_numbers = #tpu.dot_dimension_numbers<[1], [0], [0], [1], [0, 0, 1, 1], [], []>} : vector<8x96xbf16>, vector<96x128xbf16>, vector<8x128xf32> -> vector<8x128xf32>
    %343 = vector.extract_strided_slice %342 {offsets = [0, 0], sizes = [4, 128], strides = [1, 1]} : vector<8x128xf32> to vector<4x128xf32>
    %344 = vector.extract_strided_slice %342 {offsets = [4, 0], sizes = [4, 128], strides = [1, 1]} : vector<8x128xf32> to vector<4x128xf32>
    %345 = arith.addf %344, %27 : vector<4x128xf32>
    %346 = arith.negf %345 : vector<4x128xf32>
    %347 = math.exp %346 : vector<4x128xf32>
    %cst_72 = arith.constant 1.000000e+00 : f32
    %348 = vector.broadcast %cst_72 : f32 to vector<4x128xf32>
    %349 = arith.addf %348, %347 : vector<4x128xf32>
    %350 = arith.divf %348, %349 : vector<4x128xf32>
    %351 = vector.extract_strided_slice %350 {offsets = [0, 0], sizes = [4, 32], strides = [1, 1]} : vector<4x128xf32> to vector<4x32xf32>
    %352 = vector.extract_strided_slice %350 {offsets = [0, 32], sizes = [4, 32], strides = [1, 1]} : vector<4x128xf32> to vector<4x32xf32>
    %353 = vector.extract_strided_slice %350 {offsets = [0, 64], sizes = [4, 32], strides = [1, 1]} : vector<4x128xf32> to vector<4x32xf32>
    %cst_73 = arith.constant 2.000000e+00 : f32
    %354 = vector.broadcast %cst_73 : f32 to vector<4x32xf32>
    %355 = arith.mulf %354, %353 : vector<4x32xf32>
    %cst_74 = arith.constant 1.000000e+00 : f32
    %356 = vector.broadcast %cst_74 : f32 to vector<4x32xf32>
    %357 = arith.subf %355, %356 : vector<4x32xf32>
    %358 = vector.extract_strided_slice %350 {offsets = [0, 96], sizes = [4, 32], strides = [1, 1]} : vector<4x128xf32> to vector<4x32xf32>
    %359 = arith.mulf %352, %313 : vector<4x32xf32>
    %360 = arith.mulf %351, %357 : vector<4x32xf32>
    %361 = arith.addf %359, %360 : vector<4x32xf32>
    %362 = math.tanh %361 : vector<4x32xf32>
    %363 = arith.mulf %358, %362 : vector<4x32xf32>
    %c24 = arith.constant 24 : index
    %c0_75 = arith.constant 0 : index
    %364 = vector.load %arg10[%c24, %c0_75] : memref<32x32xf32, #tpu.memory_space<vmem>>, vector<4x32xf32>
    tpu.vector_store %arg10[%c24, %c0_75], %363 {strides = array<i32>} : memref<32x32xf32, #tpu.memory_space<vmem>>, vector<4x32xf32>,
    %365 = vector.extract_strided_slice %20 {offsets = [28, 0], sizes = [4, 128], strides = [1, 1]} : vector<32x128xf32> to vector<4x128xf32>
    %366 = arith.addf %365, %343 : vector<4x128xf32>
    %367 = arith.negf %366 : vector<4x128xf32>
    %368 = math.exp %367 : vector<4x128xf32>
    %cst_76 = arith.constant 1.000000e+00 : f32
    %369 = vector.broadcast %cst_76 : f32 to vector<4x128xf32>
    %370 = arith.addf %369, %368 : vector<4x128xf32>
    %371 = arith.divf %369, %370 : vector<4x128xf32>
    %372 = vector.extract_strided_slice %371 {offsets = [0, 0], sizes = [4, 32], strides = [1, 1]} : vector<4x128xf32> to vector<4x32xf32>
    %373 = vector.extract_strided_slice %371 {offsets = [0, 32], sizes = [4, 32], strides = [1, 1]} : vector<4x128xf32> to vector<4x32xf32>
    %374 = vector.extract_strided_slice %371 {offsets = [0, 64], sizes = [4, 32], strides = [1, 1]} : vector<4x128xf32> to vector<4x32xf32>
    %cst_77 = arith.constant 2.000000e+00 : f32
    %375 = vector.broadcast %cst_77 : f32 to vector<4x32xf32>
    %376 = arith.mulf %375, %374 : vector<4x32xf32>
    %cst_78 = arith.constant 1.000000e+00 : f32
    %377 = vector.broadcast %cst_78 : f32 to vector<4x32xf32>
    %378 = arith.subf %376, %377 : vector<4x32xf32>
    %379 = vector.extract_strided_slice %371 {offsets = [0, 96], sizes = [4, 32], strides = [1, 1]} : vector<4x128xf32> to vector<4x32xf32>
    %380 = arith.mulf %373, %334 : vector<4x32xf32>
    %381 = arith.mulf %372, %378 : vector<4x32xf32>
    %382 = arith.addf %380, %381 : vector<4x32xf32>
    %383 = math.tanh %382 : vector<4x32xf32>
    %384 = arith.mulf %379, %383 : vector<4x32xf32>
    %385 = arith.truncf %384 : vector<4x32xf32> to vector<4x32xbf16>
    %386 = tpu.concatenate %385, %21, %21 in 1 : vector<4x32xbf16>, vector<4x32xbf16>, vector<4x32xbf16> -> vector<4x96xbf16>
    %387 = arith.truncf %363 : vector<4x32xf32> to vector<4x32xbf16>
    %388 = tpu.concatenate %21, %385, %387 in 1 : vector<4x32xbf16>, vector<4x32xbf16>, vector<4x32xbf16> -> vector<4x96xbf16>
    %389 = tpu.concatenate %386, %388 in 0 : vector<4x96xbf16>, vector<4x96xbf16> -> vector<8x96xbf16>
    %cst_79 = arith.constant dense<0.000000e+00> : vector<8x128xf32>
    %390 = tpu.matmul %389, %1, %cst_79 {dimension_numbers = #tpu.dot_dimension_numbers<[1], [0], [0], [1], [0, 0, 1, 1], [], []>} : vector<8x96xbf16>, vector<96x128xbf16>, vector<8x128xf32> -> vector<8x128xf32>
    %391 = vector.extract_strided_slice %390 {offsets = [4, 0], sizes = [4, 128], strides = [1, 1]} : vector<8x128xf32> to vector<4x128xf32>
    %392 = arith.addf %391, %27 : vector<4x128xf32>
    %393 = arith.negf %392 : vector<4x128xf32>
    %394 = math.exp %393 : vector<4x128xf32>
    %cst_80 = arith.constant 1.000000e+00 : f32
    %395 = vector.broadcast %cst_80 : f32 to vector<4x128xf32>
    %396 = arith.addf %395, %394 : vector<4x128xf32>
    %397 = arith.divf %395, %396 : vector<4x128xf32>
    %398 = vector.extract_strided_slice %397 {offsets = [0, 0], sizes = [4, 32], strides = [1, 1]} : vector<4x128xf32> to vector<4x32xf32>
    %399 = vector.extract_strided_slice %397 {offsets = [0, 32], sizes = [4, 32], strides = [1, 1]} : vector<4x128xf32> to vector<4x32xf32>
    %400 = vector.extract_strided_slice %397 {offsets = [0, 64], sizes = [4, 32], strides = [1, 1]} : vector<4x128xf32> to vector<4x32xf32>
    %cst_81 = arith.constant 2.000000e+00 : f32
    %401 = vector.broadcast %cst_81 : f32 to vector<4x32xf32>
    %402 = arith.mulf %401, %400 : vector<4x32xf32>
    %cst_82 = arith.constant 1.000000e+00 : f32
    %403 = vector.broadcast %cst_82 : f32 to vector<4x32xf32>
    %404 = arith.subf %402, %403 : vector<4x32xf32>
    %405 = vector.extract_strided_slice %397 {offsets = [0, 96], sizes = [4, 32], strides = [1, 1]} : vector<4x128xf32> to vector<4x32xf32>
    %406 = arith.mulf %399, %361 : vector<4x32xf32>
    %407 = arith.mulf %398, %404 : vector<4x32xf32>
    %408 = arith.addf %406, %407 : vector<4x32xf32>
    %409 = math.tanh %408 : vector<4x32xf32>
    %410 = arith.mulf %405, %409 : vector<4x32xf32>
    %c28 = arith.constant 28 : index
    %c0_83 = arith.constant 0 : index
    %411 = vector.load %arg10[%c28, %c0_83] : memref<32x32xf32, #tpu.memory_space<vmem>>, vector<4x32xf32>
    tpu.vector_store %arg10[%c28, %c0_83], %410 {strides = array<i32>} : memref<32x32xf32, #tpu.memory_space<vmem>>, vector<4x32xf32>,
    %c0_84 = arith.constant 0 : index
    %c0_85 = arith.constant 0 : index
    %412 = vector.load %arg10[%c0_84, %c0_85] : memref<32x32xf32, #tpu.memory_space<vmem>>, vector<32x32xf32>
    %413 = arith.truncf %412 : vector<32x32xf32> to vector<32x32xbf16>
    %c0_86 = arith.constant 0 : index
    %c0_87 = arith.constant 0 : index
    %414 = vector.load %arg7[%c0_86, %c0_87] : memref<32x128xbf16, #tpu.memory_space<vmem>>, vector<32x128xbf16>
    %cst_88 = arith.constant dense<0.000000e+00> : vector<32x128xf32>
    %415 = tpu.matmul %413, %414, %cst_88 {dimension_numbers = #tpu.dot_dimension_numbers<[1], [0], [0], [1], [0, 0, 1, 1], [], []>} : vector<32x32xbf16>, vector<32x128xbf16>, vector<32x128xf32> -> vector<32x128xf32>
    %c0_89 = arith.constant 0 : index
    %c0_90 = arith.constant 0 : index
    %416 = vector.load %arg8[%c0_89, %c0_90] : memref<1x128xf32, #tpu.memory_space<vmem>>, vector<1x128xf32>
    %417 = vector.shape_cast %416 : vector<1x128xf32> to vector<1x128xf32>
    %418 = vector.broadcast %417 : vector<1x128xf32> to vector<32x128xf32>
    %419 = arith.addf %415, %418 : vector<32x128xf32>
    %cst_91 = arith.constant dense<0xFF800000> : vector<32xf32>
    %420 = vector.multi_reduction <maximumf>, %419, %cst_91 [1] : vector<32x128xf32> to vector<32xf32>
    %421 = vector.shape_cast %420 : vector<32xf32> to vector<32x1xf32>
    %422 = vector.broadcast %421 : vector<32x1xf32> to vector<32x128xf32>
    %423 = arith.subf %419, %422 : vector<32x128xf32>
    %424 = math.exp %423 : vector<32x128xf32>
    %cst_92 = arith.constant dense<0.000000e+00> : vector<32xf32>
    %425 = vector.multi_reduction <add>, %424, %cst_92 [1] : vector<32x128xf32> to vector<32xf32>
    %426 = vector.shape_cast %425 : vector<32xf32> to vector<32x1xf32>
    %427 = math.log %426 : vector<32x1xf32>
    %428 = vector.broadcast %427 : vector<32x1xf32> to vector<32x128xf32>
    %429 = arith.subf %423, %428 : vector<32x128xf32>
    %c0_93 = arith.constant 0 : index
    %c0_94 = arith.constant 0 : index
    %430 = vector.load %arg9[%c0_93, %c0_94] : memref<32x128xf32, #tpu.memory_space<vmem>>, vector<32x128xf32>
    tpu.vector_store %arg9[%c0_93, %c0_94], %429 {strides = array<i32>} : memref<32x128xf32, #tpu.memory_space<vmem>>, vector<32x128xf32>,
    return
  }
}

</mosaic_0001>

<bundles_post_ra>
// kernel: run.1
= control target key start
LH: loop header
LB: loop body
LE: loop exit
PB: predicated region body
PF: predicated region fallthrough
CT: control target
= control target key end

     0   :  { %v1905_v0 = vmov 0   ;;  %v50_v13 = vlaneseq  ;;  %v1906_v19 = vmov 1.0|1.0   ;;  %vm217_vm6 = vcmask 261120   ;;  %s2433_s1 = inlined_call_operand.vmem [shape: s32[32,1], index: 1, kind: input, shape index: {}]   ;;  %s2434_s2 = inlined_call_operand.vmem [shape: bf16[128,32], index: 2, kind: input, shape index: {}]   ;;  %s2435_s5 = inlined_call_operand.vmem [shape: bf16[1,64,128], index: 5, kind: input, shape index: {}]   ;;  %s2436_s3 = inlined_call_operand.vmem [shape: bf16[32,128], index: 3, kind: input, shape index: {}]   ;;  %s2437_s0 = inlined_call_operand.vmem [shape: f32[32,32], index: 0, kind: input, shape index: {}]   ;;  %s2438_s6 = inlined_call_operand.vmem [shape: f32[2,128], index: 6, kind: input, shape index: {}]   ;;  %s2439_s4 = inlined_call_operand.vmem [shape: bf16[96,128], index: 4, kind: input, shape index: {}]   ;;  %s2440_s7 = inlined_call_operand.vmem [shape: bf16[32,128], index: 7, kind: input, shape index: {}]   ;;  %s2441_s8 = inlined_call_operand.vmem [shape: f32[1,128], index: 8, kind: input, shape index: {}]   ;;  %s2442_s9 = inlined_call_operand.vmem [shape: f32[32,128], index: 9, kind: output, shape index: {}]  }
   0x1   :  { %1774 = vset.pattern.permute.xlu1 %v1905_v0  ;;  %1773 = vset.pattern.permute.xlu0 %v1905_v0  ;;  %v48_v1 = vld [vmem:[%s2433_s1 + $0x10] sm:$0xff]  ;;  %v46_v2 = vld [vmem:[%s2433_s1] sm:$0xff]  ;;  %v49_v3 = vld [vmem:[%s2433_s1 + $0x18] sm:$0xff]  ;;  %v1909_v59 = vmov 0.0   ;;  %vm1910_vm7 = vmmov 0   ;;  %vm310_vm8 = vcmask 523264  }
   0x2   :  { %59 = vperm.xlu1 %1774, %v48_v1   ;;  %53 = vperm.xlu0 %1773, %v46_v2   ;;  %v47_v4 = vld [vmem:[%s2433_s1 + $0x8] sm:$0xff]  ;;  %v1775_v5 = vld [vmem:[%s2434_s2] sm:$0xff]   ;;  %v1777_v7 = vld [vmem:[%s2434_s2 + $0x10] sm:$0xff]   ;;  %v51_v16 = vand.u32 127, %v50_v13  ;;  %v2018_v36 = vshrl.u32 %v50_v13, 7  ;;  %vm319_vm9 = vcmask 1041408  }
   0x3   :  { %v1776_v6 = vld [vmem:[%s2434_s2 + $0x8] sm:$0xff]   ;;  %1602 = vmatprep.subr.bf16.mxu0 %v1775_v5  ;;  %v1778_v8 = vld [vmem:[%s2434_s2 + $0x18] sm:$0xff]   ;;  %v1779_v9 = vld [vmem:[%s2434_s2 + $0x20] sm:$0xff]   ;;  %vm358_vm10 = vcmask 785408   ;;  %vm431_vm11 = vcmask 261124  }
   0x4   :  { %1603 = vmatpush3.bf16.msra.mxu0 %v1775_v5  ;;  %v1780_v10 = vld [vmem:[%s2434_s2 + $0x28] sm:$0xff]   ;;  %v1781_v11 = vld [vmem:[%s2434_s2 + $0x30] sm:$0xff]   ;;  %v1782_v12 = vld [vmem:[%s2434_s2 + $0x38] sm:$0xff]   ;;  %v203_v37 = vsub.s32 0, %v2018_v36 }
   0x5   :  { %1604 = vmatprep.subr.bf16.mxu0 %v1776_v6  ;;  %v1783_v20 = vld [vmem:[%s2436_s3] sm:$0xff]   ;;  %v1784_v21 = vld [vmem:[%s2436_s3 + $0x8] sm:$0xff]   ;;  %v189_v23 = vld [vmem:[%s2437_s0 + $0x10] sm:$0xff] }
   0x6   :  { %62 = vperm.xlu1 %1774, %v49_v3   ;;  %56 = vperm.xlu0 %1773, %v47_v4   ;;  %v190_v24 = vld [vmem:[%s2437_s0 + $0x18] sm:$0xff]  ;;  %v187_v26 = vld [vmem:[%s2437_s0] sm:$0xff]  ;;  %v188_v27 = vld [vmem:[%s2437_s0 + $0x8] sm:$0xff]  ;;  %s1907_s0 = smov 64  }
   0x7   :  { %1622 = vmatprep.subr.bf16.mxu1 %v1783_v20  ;;  %v2024_v38 = vld [vmem:[%s2438_s6] sm:$0x3]  ;;  %s1908_s6 = smov 32   ;;  %v2052_v61 = vld [vmem:[%s2439_s4 + $0x8] sm:$0xff]   ;;  %v2061_v62 = vld [vmem:[%s2439_s4 + $0x10] sm:$0xff]  }
   0x8   :  { %1605 = vmatpush3.bf16.msra.mxu0 %v1776_v6  ;;  %1623 = vmatpush3.bf16.msra.mxu1 %v1783_v20  ;;  %v204_v39 = vrot.slane %v2024_v38, %v203_v37  ;;  %v2045_v60 = vld [vmem:[%s2439_s4] sm:$0xff]   ;;  %v2071_v0 = vld [vmem:[%s2439_s4 + $0x18] sm:$0xff]   ;;  %v2092_v2 = vld [vmem:[%s2439_s4 + $0x28] sm:$0xff]  }
   0x9   :  { %1606 = vmatprep.subr.bf16.mxu0 %v1777_v7  ;;  %1624 = vmatprep.subr.bf16.mxu1 %v1784_v21  ;;  %v2080_v1 = vld [vmem:[%s2439_s4 + $0x20] sm:$0xff]   ;;  %s1911_s4 = smov 96  }
   0xc   :  { %1607 = vmatpush3.bf16.msra.mxu0 %v1777_v7  ;;  %1625 = vmatpush3.bf16.msra.mxu1 %v1784_v21 }
   0xd   :  { %1608 = vmatprep.subr.bf16.mxu0 %v1778_v8  ;;  %1630 = vmatprep.subr.bf16.mxu1 %v1909_v59 }
  0x10   :  { %1609 = vmatpush3.bf16.msra.mxu0 %v1778_v8 }
  0x11   :  { %1610 = vmatprep.subr.bf16.mxu0 %v1779_v9 }
  0x14   :  { %1611 = vmatpush3.bf16.msra.mxu0 %v1779_v9 }
  0x15   :  { %1612 = vmatprep.subr.bf16.mxu0 %v1780_v10 }
  0x18   :  { %1613 = vmatpush3.bf16.msra.mxu0 %v1780_v10 }
  0x19   :  { %1614 = vmatprep.subr.bf16.mxu0 %v1781_v11 }
  0x1c   :  { %1615 = vmatpush3.bf16.msra.mxu0 %v1781_v11 }
  0x1d   :  { %1616 = vmatprep.subr.bf16.mxu0 %v1782_v12 }
  0x20   :  { %1617 = vmatpush3.bf16.msra.mxu0 %v1782_v12 }
  0x21   :  { %1646 = vmatprep.subr.bf16.mxu0 %v1909_v59 }
  0x81   :  { %v60_v14 = vpop.permute.xlu1 %59  ;;  %v54_v15 = vpop.permute.xlu0 %53 }
  0x82   :  { %vm66_vm0 = vcmp.eq.s32.totalorder %v60_v14, %v51_v16  ;;  %vm64_vm3 = vcmp.eq.s32.totalorder %v54_v15, %v51_v16  ;;  %v275_v14 = vsub.s32 1, %v2018_v36 }
  0x84   :  { %v2126_v15 = vrot.slane %v2024_v38, %v275_v14 }
  0x85   :  { %v63_v17 = vpop.permute.xlu1 %62  ;;  %v57_v18 = vpop.permute.xlu0 %56 }
  0x86   :  { %vm67_vm1 = vcmp.eq.s32.totalorder %v63_v17, %v51_v16  ;;  %vm65_vm2 = vcmp.eq.s32.totalorder %v57_v18, %v51_v16 }
  0x87   :  { %vm1471_vm4 = vmpackc.low %vm67_vm1, %vm66_vm0 }
  0x88   :  { %vm1469_vm5 = vmpackc.low %vm65_vm2, %vm64_vm3 }
  0x89   :  { %1618 = vmatprep.mubr.msk.bf16.mxu0 %vm1469_vm5, %v1906_v19 }
  0x8a   :  { %1619 = vmatmul.mubr.msk.bf16.vlgmr.msra.gmra.mrb[0].mxu0 %vm1471_vm4, %v1906_v19 }
  0x8b   :  { %1647 = vmatpush3.bf16.msra.mxu0 %v2045_v60  ;;  %1658 = vmatprep.mubr.msk.bf16.mxu0 %vm1910_vm7, %v1909_v59 }
  0x8c   :  { %1648 = vmatprep.subr.bf16.mxu0 %v1909_v59 }
  0x8f   :  { %1649 = vmatpush3.bf16.msra.mxu0 %v2052_v61 }
  0x90   :  { %1650 = vmatprep.subr.bf16.mxu0 %v1909_v59 }
  0x93   :  { %1651 = vmatpush3.bf16.msra.mxu0 %v2061_v62 }
  0x94   :  { %1652 = vmatprep.subr.bf16.mxu0 %v1909_v59 }
  0x97   :  { %1653 = vmatpush3.bf16.msra.mxu0 %v2071_v0 }
  0x98   :  { %1654 = vmatprep.subr.bf16.mxu0 %v1909_v59 }
  0x9b   :  { %1655 = vmatpush3.bf16.msra.mxu0 %v2080_v1 }
  0x9c   :  { %1656 = vmatprep.subr.bf16.mxu0 %v1909_v59 }
  0x9f   :  { %1657 = vmatpush3.bf16.msra.mxu0 %v2092_v2 }
  0xa0   :  { %1678 = vmatprep.subr.bf16.mxu0 %v1909_v59 }
 0x15d   :  { %v1620_v22 = vpop.f32.mrb[0].mxu0 }
 0x15e   :  { %v172_v25 = vpop.f32.mrb[1].mxu0  ;;  %v193_v29 = vadd.f32 %v1620_v22, %v189_v23 }
 0x15f   :  { %v1621_v28 = vpop.f32.mrb[2].mxu0  ;;  %v191_v32 = vadd.f32 %v187_v26, %v172_v25 }
 0x160   :  { %v194_v30 = vadd.f32 %v1621_v28, %v190_v24  ;;  %v175_v31 = vpop.f32.mrb[3].mxu0 }
 0x161   :  { %v192_v33 = vadd.f32 %v188_v27, %v175_v31 }
 0x162   :  { %v196_v34 = vpack.c.bf16 %v194_v30, %v193_v29 }
 0x163   :  { %v195_v35 = vpack.c.bf16 %v192_v33, %v191_v32 }
 0x165   :  { %1626 = vmatprep.mubr.msk.bf16.mxu1 %vm217_vm6, %v195_v35 }
 0x166   :  { %1627 = vmatmul.mubr.msk.bf16.vlgmr.msra.gmra.mrb[0].mxu1 %vm217_vm6, %v196_v34 }
 0x167   :  { %1631 = vmatpush3.bf16.msra.mxu1 %v2045_v60  ;;  %1642 = vmatprep.mubr.msk.bf16.mxu1 %vm1910_vm7, %v1909_v59 }
 0x168   :  { %1632 = vmatprep.subr.bf16.mxu1 %v1909_v59 }
 0x16b   :  { %1633 = vmatpush3.bf16.msra.mxu1 %v2052_v61 }
 0x16c   :  { %1634 = vmatprep.subr.bf16.mxu1 %v1909_v59 }
 0x16f   :  { %1635 = vmatpush3.bf16.msra.mxu1 %v2061_v62 }
 0x170   :  { %1636 = vmatprep.subr.bf16.mxu1 %v1909_v59 }
 0x173   :  { %1637 = vmatpush3.bf16.msra.mxu1 %v2071_v0 }
 0x174   :  { %1638 = vmatprep.subr.bf16.mxu1 %v1909_v59 }
 0x177   :  { %1639 = vmatpush3.bf16.msra.mxu1 %v2080_v1 }
 0x178   :  { %1640 = vmatprep.subr.bf16.mxu1 %v1909_v59 }
 0x17b   :  { %1641 = vmatpush3.bf16.msra.mxu1 %v2092_v2 }
 0x17c   :  { %1662 = vmatprep.subr.bf16.mxu1 %v1909_v59 }
 0x239   :  { %v1628_v40 = vpop.f32.mrb[0].mxu1 }
 0x23a   :  { %v2027_v41 = vadd.f32 %v1628_v40, %v204_v39  ;;  %v258_v42 = vpop.f32.mrb[1].mxu1 }
 0x23b   :  { %v2029_v43 = vadd.f32 %v258_v42, %v204_v39  ;;  %v1629_v44 = vpop.f32.mrb[2].mxu1 }
 0x23c   :  { %v2031_v45 = vadd.f32 %v1629_v44, %v204_v39  ;;  %v261_v46 = vpop.f32.mrb[3].mxu1 }
 0x23d   :  { %v1477_v47 = vmul.f32 -1.442695, %v2029_v43  ;;  %v2034_v48 = vadd.f32 %v261_v46, %v204_v39 }
 0x23f   :  { %1793 = vpow2.f32 %v1477_v47 }
 0x249   :  { %v1794_v49 = vpop.eup %1793 }
 0x24a   :  { %v281_v50 = vadd.f32 1.0, %v1794_v49 }
 0x24c   :  { %1795 = vrcp.f32 %v281_v50 }
 0x256   :  { %v1796_v51 = vpop.eup %1795 }
 0x257   :  { %v284_v52 = vmul.f32 2.0, %v1796_v51  ;;  %v286_v56 = vmul.f32 0.0, %v1796_v51 }
 0x259   :  { %v1478_v53 = vadd.f32 -1.0, %v284_v52 }
 0x25b   :  { %288 = vrot.lane.b32.xlu0 %v1478_v53, %s1907_s0 }
 0x2cd   :  { %v289_v54 = vpop.permute.xlu0 %288 }
 0x2ce   :  { %v291_v55 = vmul.f32 %v1796_v51, %v289_v54 }
 0x2d0   :  { %293 = vrot.lane.b32.xlu1 %v291_v55, %s1908_s6 }
 0x342   :  { %v294_v57 = vpop.permute.xlu1 %293 }
 0x343   :  { %v2038_v58 = vadd.f32 %v294_v57, %v286_v56 }
 0x345   :  { %1797 = vtanh.f32 %v2038_v58  ;;  %v446_v39 = vrot.slane %v2038_v58, 4 }
 0x34f   :  { %v1798_v63 = vpop.eup %1797 }
 0x350   :  { %299 = vrot.lane.b32.xlu0 %v1798_v63, %s1907_s0 }
 0x3c2   :  { %v300_v3 = vpop.permute.xlu0 %299 }
 0x3c3   :  { %v302_v4 = vmul.f32 %v1796_v51, %v300_v3 }
 0x3c5   :  { %v303_v5 = vpack.c.bf16 %v302_v4, %v302_v4 }
 0x3c7   :  { %305 = vrot.lane.b32.xlu0 %v303_v5, %s1908_s6  ;;  %312 = vrot.lane.b32.xlu1 %v303_v5, %s1907_s0 }
 0x439   :  { %v306_v6 = vpop.permute.xlu0 %305  ;;  %v313_v7 = vpop.permute.xlu1 %312 }
 0x43a   :  { %v309_v8 = vsel %vm217_vm6, %v306_v6, 0  ;;  %v315_v9 = vsel %vm217_vm6, 0, %v313_v7 }
 0x43b   :  { %v316_v10 = vsel %vm310_vm8, %v315_v9, 0  ;;  %v311_v12 = vsel %vm310_vm8, %v309_v8, 0 }
 0x43c   :  { %v318_v11 = vrot.slane %v316_v10, 6 }
 0x43e   :  { %v321_v13 = vsel %vm319_vm9, %v311_v12, %v318_v11 }
 0x43f   :  { %1643 = vmatmul.mubr.msk.bf16.vlgmr.msra.gmra.mrb[4].mxu1 %vm358_vm10, %v321_v13 }
 0x440   :  { %1663 = vmatpush3.bf16.msra.mxu1 %v2045_v60  ;;  %1674 = vmatprep.mubr.msk.bf16.mxu1 %vm1910_vm7, %v1909_v59 }
 0x441   :  { %1664 = vmatprep.subr.bf16.mxu1 %v1909_v59 }
 0x444   :  { %1665 = vmatpush3.bf16.msra.mxu1 %v2052_v61 }
 0x445   :  { %1666 = vmatprep.subr.bf16.mxu1 %v1909_v59 }
 0x448   :  { %1667 = vmatpush3.bf16.msra.mxu1 %v2061_v62 }
 0x449   :  { %1668 = vmatprep.subr.bf16.mxu1 %v1909_v59 }
 0x44c   :  { %1669 = vmatpush3.bf16.msra.mxu1 %v2071_v0 }
 0x44d   :  { %1670 = vmatprep.subr.bf16.mxu1 %v1909_v59 }
 0x450   :  { %1671 = vmatpush3.bf16.msra.mxu1 %v2080_v1 }
 0x451   :  { %1672 = vmatprep.subr.bf16.mxu1 %v1909_v59 }
 0x454   :  { %1673 = vmatpush3.bf16.msra.mxu1 %v2092_v2 }
 0x455   :  { %1694 = vmatprep.subr.bf16.mxu1 %v1909_v59 }
 0x512   :  { %v395_v16 = vpop.f32.mrb[4].mxu1 }
 0x513   :  { %v401_v17 = vadd.f32 %v395_v16, %v2126_v15  ;;  %v434_v18 = vrot.slane %v395_v16, 4  ;;  %v1644_v19 = vpop.f32.mrb[5].mxu1 }
 0x514   :  { %v398_v20 = vpop.f32.mrb[6].mxu1 }
 0x515   :  { %v1486_v21 = vmul.f32 -1.442695, %v401_v17  ;;  %v436_v22 = vadd.f32 %v434_v18, %v2029_v43  ;;  %v1645_v23 = vpop.f32.mrb[7].mxu1 }
 0x517   :  { %1799 = vpow2.f32 %v1486_v21  ;;  %v1488_v24 = vmul.f32 -1.442695, %v436_v22 }
 0x519   :  { %1801 = vpow2.f32 %v1488_v24 }
 0x521   :  { %v1800_v25 = vpop.eup %1799 }
 0x522   :  { %v405_v26 = vadd.f32 1.0, %v1800_v25 }
 0x523   :  { %v1802_v27 = vpop.eup %1801 }
 0x524   :  { %1803 = vrcp.f32 %v405_v26  ;;  %v440_v28 = vadd.f32 1.0, %v1802_v27 }
 0x526   :  { %1805 = vrcp.f32 %v440_v28 }
 0x52e   :  { %v1804_v29 = vpop.eup %1803 }
 0x52f   :  { %v408_v30 = vmul.f32 2.0, %v1804_v29  ;;  %v410_v40 = vmul.f32 0.0, %v1804_v29 }
 0x530   :  { %v1806_v31 = vpop.eup %1805 }
 0x531   :  { %v1487_v32 = vadd.f32 -1.0, %v408_v30  ;;  %v443_v33 = vmul.f32 2.0, %v1806_v31  ;;  %v448_v44 = vmul.f32 %v1806_v31, %v446_v39 }
 0x533   :  { %412 = vrot.lane.b32.xlu0 %v1487_v32, %s1907_s0  ;;  %v1489_v34 = vadd.f32 -1.0, %v443_v33 }
 0x535   :  { %450 = vrot.lane.b32.xlu1 %v1489_v34, %s1907_s0 }
 0x5a5   :  { %v413_v35 = vpop.permute.xlu0 %412 }
 0x5a6   :  { %v415_v36 = vmul.f32 %v1804_v29, %v413_v35 }
 0x5a7   :  { %v451_v37 = vpop.permute.xlu1 %450 }
 0x5a8   :  { %v453_v38 = vmul.f32 %v1806_v31, %v451_v37  ;;  %417 = vrot.lane.b32.xlu0 %v415_v36, %s1908_s6 }
 0x5aa   :  { %455 = vrot.lane.b32.xlu1 %v453_v38, %s1908_s6 }
 0x61a   :  { %v418_v42 = vpop.permute.xlu0 %417 }
 0x61b   :  { %v2135_v43 = vadd.f32 %v418_v42, %v410_v40 }
 0x61c   :  { %v456_v46 = vpop.permute.xlu1 %455 }
 0x61d   :  { %1807 = vtanh.f32 %v2135_v43  ;;  %v2138_v47 = vadd.f32 %v456_v46, %v448_v44 }
 0x61f   :  { %1809 = vtanh.f32 %v2138_v47  ;;  %v574_v35 = vrot.slane %v2138_v47, 4 }
 0x627   :  { %v1808_v49 = vpop.eup %1807 }
 0x628   :  { %423 = vrot.lane.b32.xlu0 %v1808_v49, %s1907_s0 }
 0x629   :  { %v1810_v50 = vpop.eup %1809 }
 0x62a   :  { %461 = vrot.lane.b32.xlu1 %v1810_v50, %s1907_s0 }
 0x69a   :  { %v424_v51 = vpop.permute.xlu0 %423 }
 0x69b   :  { %v2143_v52 = vmul.f32 %v1804_v29, %v424_v51 }
 0x69c   :  { %v462_v53 = vpop.permute.xlu1 %461 }
 0x69d   :  { %v464_v54 = vmul.f32 %v1806_v31, %v462_v53  ;;  %v472_v55 = vpack.c.bf16 %v2143_v52, %v2143_v52 }
 0x69f   :  { %v465_v56 = vpack.c.bf16 %v464_v54, %v464_v54  ;;  %v477_v58 = vrot.slane %v472_v55, 2 }
 0x6a1   :  { %v473_v57 = vrot.slane %v465_v56, 2  ;;  %467 = vrot.lane.b32.xlu1 %v465_v56, %s1908_s6 }
 0x6a3   :  { %474 = vrot.lane.b32.xlu0 %v473_v57, %s1907_s0 }
 0x6a5   :  { %478 = vrot.lane.b32.xlu1 %v477_v58, %s1911_s4 }
 0x713   :  { %v468_v63 = vpop.permute.xlu1 %467 }
 0x714   :  { %v470_v3 = vsel %vm217_vm6, %v468_v63, 0 }
 0x715   :  { %v475_v4 = vpop.permute.xlu0 %474  ;;  %v471_v5 = vsel %vm310_vm8, %v470_v3, 0 }
 0x716   :  { %v481_v6 = vsel %vm217_vm6, 0, %v475_v4  ;;  %v485_v9 = vrot.slane %v471_v5, 2 }
 0x717   :  { %v479_v7 = vpop.permute.xlu1 %478 }
 0x718   :  { %v483_v8 = vsel %vm310_vm8, %v481_v6, %v479_v7 }
 0x719   :  { %v487_v10 = vrot.slane %v483_v8, 6 }
 0x71b   :  { %v490_v11 = vsel %vm319_vm9, %v485_v9, %v487_v10 }
 0x71c   :  { %1659 = vmatmul.mubr.msk.bf16.vlgmr.msra.gmra.mrb[4].mxu0 %vm358_vm10, %v490_v11 }
 0x71d   :  { %1679 = vmatpush3.bf16.msra.mxu0 %v2045_v60  ;;  %1690 = vmatprep.mubr.msk.bf16.mxu0 %vm1910_vm7, %v1909_v59 }
 0x71e   :  { %1680 = vmatprep.subr.bf16.mxu0 %v1909_v59 }
 0x721   :  { %1681 = vmatpush3.bf16.msra.mxu0 %v2052_v61 }
 0x722   :  { %1682 = vmatprep.subr.bf16.mxu0 %v1909_v59 }
 0x725   :  { %1683 = vmatpush3.bf16.msra.mxu0 %v2061_v62 }
 0x726   :  { %1684 = vmatprep.subr.bf16.mxu0 %v1909_v59 }
 0x729   :  { %1685 = vmatpush3.bf16.msra.mxu0 %v2071_v0 }
 0x72a   :  { %1686 = vmatprep.subr.bf16.mxu0 %v1909_v59 }
 0x72d   :  { %1687 = vmatpush3.bf16.msra.mxu0 %v2080_v1 }
 0x72e   :  { %1688 = vmatprep.subr.bf16.mxu0 %v1909_v59 }
 0x731   :  { %1689 = vmatpush3.bf16.msra.mxu0 %v2092_v2 }
 0x732   :  { %1710 = vmatprep.subr.bf16.mxu0 %v1909_v59 }
 0x7ef   :  { %v527_v12 = vpop.f32.mrb[4].mxu0 }
 0x7f0   :  { %v533_v13 = vadd.f32 %v527_v12, %v2126_v15  ;;  %v564_v14 = vadd.f32 %v527_v12, %v2034_v48  ;;  %v1660_v16 = vpop.f32.mrb[5].mxu0 }
 0x7f1   :  { %v530_v17 = vpop.f32.mrb[6].mxu0 }
 0x7f2   :  { %v1491_v18 = vmul.f32 -1.442695, %v533_v13  ;;  %v1493_v19 = vmul.f32 -1.442695, %v564_v14  ;;  %v1661_v20 = vpop.f32.mrb[7].mxu0 }
 0x7f4   :  { %1811 = vpow2.f32 %v1491_v18 }
 0x7f5   :  { %1813 = vpow2.f32 %v1493_v19 }
 0x7fe   :  { %v1812_v21 = vpop.eup %1811 }
 0x7ff   :  { %v1814_v22 = vpop.eup %1813  ;;  %v537_v23 = vadd.f32 1.0, %v1812_v21 }
 0x800   :  { %v568_v24 = vadd.f32 1.0, %v1814_v22 }
 0x801   :  { %1815 = vrcp.f32 %v537_v23 }
 0x802   :  { %1817 = vrcp.f32 %v568_v24 }
 0x80b   :  { %v1816_v25 = vpop.eup %1815 }
 0x80c   :  { %v1818_v26 = vpop.eup %1817  ;;  %v540_v27 = vmul.f32 2.0, %v1816_v25  ;;  %v542_v36 = vmul.f32 %v1816_v25, %v2135_v43 }
 0x80d   :  { %v571_v28 = vmul.f32 2.0, %v1818_v26  ;;  %v576_v37 = vmul.f32 %v1818_v26, %v574_v35 }
 0x80e   :  { %v1492_v29 = vadd.f32 -1.0, %v540_v27 }
 0x80f   :  { %v1494_v30 = vadd.f32 -1.0, %v571_v28 }
 0x810   :  { %544 = vrot.lane.b32.xlu0 %v1492_v29, %s1907_s0 }
 0x811   :  { %578 = vrot.lane.b32.xlu1 %v1494_v30, %s1907_s0 }
 0x882   :  { %v545_v31 = vpop.permute.xlu0 %544 }
 0x883   :  { %v579_v32 = vpop.permute.xlu1 %578  ;;  %v547_v33 = vmul.f32 %v1816_v25, %v545_v31 }
 0x884   :  { %v581_v34 = vmul.f32 %v1818_v26, %v579_v32 }
 0x885   :  { %549 = vrot.lane.b32.xlu0 %v547_v33, %s1908_s6 }
 0x886   :  { %583 = vrot.lane.b32.xlu1 %v581_v34, %s1908_s6 }
 0x8f7   :  { %v550_v38 = vpop.permute.xlu0 %549 }
 0x8f8   :  { %v584_v39 = vpop.permute.xlu1 %583  ;;  %v2178_v40 = vadd.f32 %v550_v38, %v542_v36 }
 0x8f9   :  { %v2180_v42 = vadd.f32 %v584_v39, %v576_v37 }
 0x8fa   :  { %1819 = vtanh.f32 %v2178_v40 }
 0x8fb   :  { %1821 = vtanh.f32 %v2180_v42  ;;  %v701_v30 = vrot.slane %v2180_v42, 4 }
 0x904   :  { %v1820_v44 = vpop.eup %1819 }
 0x905   :  { %v1822_v46 = vpop.eup %1821  ;;  %555 = vrot.lane.b32.xlu0 %v1820_v44, %s1907_s0 }
 0x906   :  { %589 = vrot.lane.b32.xlu1 %v1822_v46, %s1907_s0 }
 0x977   :  { %v556_v47 = vpop.permute.xlu0 %555 }
 0x978   :  { %v590_v49 = vpop.permute.xlu1 %589  ;;  %v2186_v43 = vmul.f32 %v1816_v25, %v556_v47 }
 0x979   :  { %v592_v50 = vmul.f32 %v1818_v26, %v590_v49 }
 0x97a   :  { %v600_v51 = vpack.c.bf16 %v2186_v43, %v2186_v43 }
 0x97b   :  { %v593_v53 = vpack.c.bf16 %v592_v50, %v592_v50 }
 0x97c   :  { %v604_v54 = vrot.slane %v600_v51, 2 }
 0x97d   :  { %601 = vrot.lane.b32.xlu0 %v593_v53, %s1907_s0 }
 0x97e   :  { %605 = vrot.lane.b32.xlu1 %v604_v54, %s1911_s4 }
 0x981   :  { %595 = vrot.lane.b32.xlu0 %v593_v53, %s1908_s6 }
 0x9ef   :  { %v602_v55 = vpop.permute.xlu0 %601 }
 0x9f0   :  { %v608_v56 = vsel %vm217_vm6, 0, %v602_v55  ;;  %v606_v57 = vpop.permute.xlu1 %605 }
 0x9f1   :  { %v610_v58 = vsel %vm310_vm8, %v608_v56, %v606_v57 }
 0x9f2   :  { %v612_v63 = vrot.slane %v610_v58, 6 }
 0x9f3   :  { %v596_v3 = vpop.permute.xlu0 %595 }
 0x9f4   :  { %v598_v4 = vsel %vm217_vm6, %v596_v3, 0 }
 0x9f5   :  { %v599_v5 = vsel %vm310_vm8, %v598_v4, 0 }
 0x9f6   :  { %v614_v6 = vsel %vm319_vm9, %v599_v5, %v612_v63 }
 0x9f7   :  { %1675 = vmatmul.mubr.msk.bf16.vlgmr.msra.gmra.mrb[8].mxu1 %vm358_vm10, %v614_v6 }
 0x9f8   :  { %1695 = vmatpush3.bf16.msra.mxu1 %v2045_v60  ;;  %1706 = vmatprep.mubr.msk.bf16.mxu1 %vm1910_vm7, %v1909_v59 }
 0x9f9   :  { %1696 = vmatprep.subr.bf16.mxu1 %v1909_v59 }
 0x9fc   :  { %1697 = vmatpush3.bf16.msra.mxu1 %v2052_v61 }
 0x9fd   :  { %1698 = vmatprep.subr.bf16.mxu1 %v1909_v59 }
 0xa00   :  { %1699 = vmatpush3.bf16.msra.mxu1 %v2061_v62 }
 0xa01   :  { %1700 = vmatprep.subr.bf16.mxu1 %v1909_v59 }
 0xa04   :  { %1701 = vmatpush3.bf16.msra.mxu1 %v2071_v0 }
 0xa05   :  { %1702 = vmatprep.subr.bf16.mxu1 %v1909_v59 }
 0xa08   :  { %1703 = vmatpush3.bf16.msra.mxu1 %v2080_v1 }
 0xa09   :  { %1704 = vmatprep.subr.bf16.mxu1 %v1909_v59 }
 0xa0c   :  { %1705 = vmatpush3.bf16.msra.mxu1 %v2092_v2 }
 0xa0d   :  { %1726 = vmatprep.subr.bf16.mxu1 %v1909_v59 }
 0xaca   :  { %v651_v7 = vpop.f32.mrb[8].mxu1 }
 0xacb   :  { %v657_v8 = vadd.f32 %v651_v7, %v2126_v15  ;;  %v689_v9 = vrot.slane %v651_v7, 4  ;;  %v1676_v10 = vpop.f32.mrb[9].mxu1 }
 0xacc   :  { %v654_v11 = vpop.f32.mrb[10].mxu1 }
 0xacd   :  { %v1496_v12 = vmul.f32 -1.442695, %v657_v8  ;;  %v691_v13 = vadd.f32 %v689_v9, %v2034_v48  ;;  %v1677_v14 = vpop.f32.mrb[11].mxu1 }
 0xacf   :  { %1823 = vpow2.f32 %v1496_v12  ;;  %v1498_v16 = vmul.f32 -1.442695, %v691_v13 }
 0xad1   :  { %1825 = vpow2.f32 %v1498_v16 }
 0xad9   :  { %v1824_v17 = vpop.eup %1823 }
 0xada   :  { %v661_v18 = vadd.f32 1.0, %v1824_v17 }
 0xadb   :  { %v1826_v19 = vpop.eup %1825 }
 0xadc   :  { %1827 = vrcp.f32 %v661_v18  ;;  %v695_v20 = vadd.f32 1.0, %v1826_v19 }
 0xade   :  { %1829 = vrcp.f32 %v695_v20 }
 0xae6   :  { %v1828_v21 = vpop.eup %1827 }
 0xae7   :  { %v664_v22 = vmul.f32 2.0, %v1828_v21  ;;  %v666_v31 = vmul.f32 %v1828_v21, %v2178_v40 }
 0xae8   :  { %v1830_v23 = vpop.eup %1829 }
 0xae9   :  { %v1497_v24 = vadd.f32 -1.0, %v664_v22  ;;  %v698_v25 = vmul.f32 2.0, %v1830_v23  ;;  %v703_v34 = vmul.f32 %v1830_v23, %v701_v30 }
 0xaeb   :  { %668 = vrot.lane.b32.xlu0 %v1497_v24, %s1907_s0  ;;  %v1499_v26 = vadd.f32 -1.0, %v698_v25 }
 0xaed   :  { %705 = vrot.lane.b32.xlu1 %v1499_v26, %s1907_s0 }
 0xb5d   :  { %v669_v48 = vpop.permute.xlu0 %668 }
 0xb5e   :  { %v671_v27 = vmul.f32 %v1828_v21, %v669_v48 }
 0xb5f   :  { %v706_v28 = vpop.permute.xlu1 %705 }
 0xb60   :  { %v708_v29 = vmul.f32 %v1830_v23, %v706_v28  ;;  %673 = vrot.lane.b32.xlu0 %v671_v27, %s1908_s6 }
 0xb62   :  { %710 = vrot.lane.b32.xlu1 %v708_v29, %s1908_s6 }
 0xbd2   :  { %v674_v32 = vpop.permute.xlu0 %673 }
 0xbd3   :  { %v2221_v33 = vadd.f32 %v674_v32, %v666_v31 }
 0xbd4   :  { %v711_v35 = vpop.permute.xlu1 %710 }
 0xbd5   :  { %1831 = vtanh.f32 %v2221_v33  ;;  %v2224_v36 = vadd.f32 %v711_v35, %v703_v34 }
 0xbd7   :  { %1833 = vtanh.f32 %v2224_v36  ;;  %v829_v27 = vrot.slane %v2224_v36, 4 }
 0xbdf   :  { %v1832_v37 = vpop.eup %1831 }
 0xbe0   :  { %679 = vrot.lane.b32.xlu0 %v1832_v37, %s1907_s0 }
 0xbe1   :  { %v1834_v38 = vpop.eup %1833 }
 0xbe2   :  { %716 = vrot.lane.b32.xlu1 %v1834_v38, %s1907_s0 }
 0xc52   :  { %v680_v39 = vpop.permute.xlu0 %679 }
 0xc53   :  { %v2229_v42 = vmul.f32 %v1828_v21, %v680_v39 }
 0xc54   :  { %v717_v40 = vpop.permute.xlu1 %716 }
 0xc55   :  { %v719_v44 = vmul.f32 %v1830_v23, %v717_v40  ;;  %v727_v46 = vpack.c.bf16 %v2229_v42, %v2229_v42 }
 0xc57   :  { %v720_v47 = vpack.c.bf16 %v719_v44, %v719_v44  ;;  %v732_v50 = vrot.slane %v727_v46, 2 }
 0xc59   :  { %v728_v49 = vrot.slane %v720_v47, 2  ;;  %722 = vrot.lane.b32.xlu1 %v720_v47, %s1908_s6 }
 0xc5b   :  { %729 = vrot.lane.b32.xlu0 %v728_v49, %s1907_s0 }
 0xc5d   :  { %733 = vrot.lane.b32.xlu1 %v732_v50, %s1911_s4 }
 0xccb   :  { %v723_v51 = vpop.permute.xlu1 %722 }
 0xccc   :  { %v725_v53 = vsel %vm217_vm6, %v723_v51, 0 }
 0xccd   :  { %v730_v54 = vpop.permute.xlu0 %729  ;;  %v726_v55 = vsel %vm310_vm8, %v725_v53, 0 }
 0xcce   :  { %v736_v56 = vsel %vm217_vm6, 0, %v730_v54  ;;  %v740_v63 = vrot.slane %v726_v55, 2 }
 0xccf   :  { %v734_v57 = vpop.permute.xlu1 %733 }
 0xcd0   :  { %v738_v58 = vsel %vm310_vm8, %v736_v56, %v734_v57 }
 0xcd1   :  { %v742_v3 = vrot.slane %v738_v58, 6 }
 0xcd3   :  { %v745_v4 = vsel %vm319_vm9, %v740_v63, %v742_v3 }
 0xcd4   :  { %1691 = vmatmul.mubr.msk.bf16.vlgmr.msra.gmra.mrb[8].mxu0 %vm358_vm10, %v745_v4 }
 0xcd5   :  { %1711 = vmatpush3.bf16.msra.mxu0 %v2045_v60  ;;  %1722 = vmatprep.mubr.msk.bf16.mxu0 %vm1910_vm7, %v1909_v59 }
 0xcd6   :  { %1712 = vmatprep.subr.bf16.mxu0 %v1909_v59 }
 0xcd9   :  { %1713 = vmatpush3.bf16.msra.mxu0 %v2052_v61 }
 0xcda   :  { %1714 = vmatprep.subr.bf16.mxu0 %v1909_v59 }
 0xcdd   :  { %1715 = vmatpush3.bf16.msra.mxu0 %v2061_v62 }
 0xcde   :  { %1716 = vmatprep.subr.bf16.mxu0 %v1909_v59 }
 0xce1   :  { %1717 = vmatpush3.bf16.msra.mxu0 %v2071_v0 }
 0xce2   :  { %1718 = vmatprep.subr.bf16.mxu0 %v1909_v59 }
 0xce5   :  { %1719 = vmatpush3.bf16.msra.mxu0 %v2080_v1 }
 0xce6   :  { %1720 = vmatprep.subr.bf16.mxu0 %v1909_v59 }
 0xce9   :  { %1721 = vmatpush3.bf16.msra.mxu0 %v2092_v2 }
 0xcea   :  { %1742 = vmatprep.subr.bf16.mxu0 %v1909_v59 }
 0xda7   :  { %v782_v5 = vpop.f32.mrb[8].mxu0 }
 0xda8   :  { %v788_v6 = vadd.f32 %v782_v5, %v2126_v15  ;;  %v819_v7 = vadd.f32 %v782_v5, %v2027_v41  ;;  %v1692_v8 = vpop.f32.mrb[9].mxu0 }
 0xda9   :  { %v785_v9 = vpop.f32.mrb[10].mxu0 }
 0xdaa   :  { %v1501_v10 = vmul.f32 -1.442695, %v788_v6  ;;  %v1503_v11 = vmul.f32 -1.442695, %v819_v7  ;;  %v1693_v12 = vpop.f32.mrb[11].mxu0 }
 0xdac   :  { %1835 = vpow2.f32 %v1501_v10 }
 0xdad   :  { %1837 = vpow2.f32 %v1503_v11 }
 0xdb6   :  { %v1836_v13 = vpop.eup %1835 }
 0xdb7   :  { %v1838_v14 = vpop.eup %1837  ;;  %v792_v16 = vadd.f32 1.0, %v1836_v13 }
 0xdb8   :  { %v823_v17 = vadd.f32 1.0, %v1838_v14 }
 0xdb9   :  { %1839 = vrcp.f32 %v792_v16 }
 0xdba   :  { %1841 = vrcp.f32 %v823_v17 }
 0xdc3   :  { %v1840_v18 = vpop.eup %1839 }
 0xdc4   :  { %v1842_v19 = vpop.eup %1841  ;;  %v795_v20 = vmul.f32 2.0, %v1840_v18  ;;  %v797_v28 = vmul.f32 %v1840_v18, %v2221_v33 }
 0xdc5   :  { %v826_v21 = vmul.f32 2.0, %v1842_v19  ;;  %v831_v29 = vmul.f32 %v1842_v19, %v829_v27 }
 0xdc6   :  { %v1502_v22 = vadd.f32 -1.0, %v795_v20 }
 0xdc7   :  { %v1504_v23 = vadd.f32 -1.0, %v826_v21 }
 0xdc8   :  { %799 = vrot.lane.b32.xlu0 %v1502_v22, %s1907_s0 }
 0xdc9   :  { %833 = vrot.lane.b32.xlu1 %v1504_v23, %s1907_s0 }
 0xe3a   :  { %v800_v24 = vpop.permute.xlu0 %799 }
 0xe3b   :  { %v834_v25 = vpop.permute.xlu1 %833  ;;  %v802_v26 = vmul.f32 %v1840_v18, %v800_v24 }
 0xe3c   :  { %v836_v48 = vmul.f32 %v1842_v19, %v834_v25 }
 0xe3d   :  { %804 = vrot.lane.b32.xlu0 %v802_v26, %s1908_s6 }
 0xe3e   :  { %838 = vrot.lane.b32.xlu1 %v836_v48, %s1908_s6 }
 0xeaf   :  { %v805_v30 = vpop.permute.xlu0 %804 }
 0xeb0   :  { %v839_v31 = vpop.permute.xlu1 %838  ;;  %v2264_v32 = vadd.f32 %v805_v30, %v797_v28 }
 0xeb1   :  { %v2266_v34 = vadd.f32 %v839_v31, %v831_v29 }
 0xeb2   :  { %1843 = vtanh.f32 %v2264_v32 }
 0xeb3   :  { %1845 = vtanh.f32 %v2266_v34  ;;  %v956_v24 = vrot.slane %v2266_v34, 4 }
 0xebc   :  { %v1844_v35 = vpop.eup %1843 }
 0xebd   :  { %v1846_v37 = vpop.eup %1845  ;;  %810 = vrot.lane.b32.xlu0 %v1844_v35, %s1907_s0 }
 0xebe   :  { %844 = vrot.lane.b32.xlu1 %v1846_v37, %s1907_s0 }
 0xf2f   :  { %v811_v36 = vpop.permute.xlu0 %810 }
 0xf30   :  { %v845_v38 = vpop.permute.xlu1 %844  ;;  %v2272_v33 = vmul.f32 %v1840_v18, %v811_v36 }
 0xf31   :  { %v847_v39 = vmul.f32 %v1842_v19, %v845_v38 }
 0xf32   :  { %v855_v40 = vpack.c.bf16 %v2272_v33, %v2272_v33 }
 0xf33   :  { %v848_v44 = vpack.c.bf16 %v847_v39, %v847_v39 }
 0xf34   :  { %v859_v46 = vrot.slane %v855_v40, 2 }
 0xf35   :  { %856 = vrot.lane.b32.xlu0 %v848_v44, %s1907_s0 }
 0xf36   :  { %860 = vrot.lane.b32.xlu1 %v859_v46, %s1911_s4 }
 0xf39   :  { %850 = vrot.lane.b32.xlu0 %v848_v44, %s1908_s6 }
 0xfa7   :  { %v857_v47 = vpop.permute.xlu0 %856 }
 0xfa8   :  { %v863_v49 = vsel %vm217_vm6, 0, %v857_v47  ;;  %v861_v50 = vpop.permute.xlu1 %860 }
 0xfa9   :  { %v865_v51 = vsel %vm310_vm8, %v863_v49, %v861_v50 }
 0xfaa   :  { %v867_v53 = vrot.slane %v865_v51, 6 }
 0xfab   :  { %v851_v54 = vpop.permute.xlu0 %850 }
 0xfac   :  { %v853_v55 = vsel %vm217_vm6, %v851_v54, 0 }
 0xfad   :  { %v854_v56 = vsel %vm310_vm8, %v853_v55, 0 }
 0xfae   :  { %v869_v57 = vsel %vm319_vm9, %v854_v56, %v867_v53 }
 0xfaf   :  { %1707 = vmatmul.mubr.msk.bf16.vlgmr.msra.gmra.mrb[12].mxu1 %vm358_vm10, %v869_v57 }
 0xfb0   :  { %1727 = vmatpush3.bf16.msra.mxu1 %v2045_v60  ;;  %1738 = vmatprep.mubr.msk.bf16.mxu1 %vm1910_vm7, %v1909_v59 }
 0xfb1   :  { %1728 = vmatprep.subr.bf16.mxu1 %v1909_v59 }
 0xfb4   :  { %1729 = vmatpush3.bf16.msra.mxu1 %v2052_v61 }
 0xfb5   :  { %1730 = vmatprep.subr.bf16.mxu1 %v1909_v59 }
 0xfb8   :  { %1731 = vmatpush3.bf16.msra.mxu1 %v2061_v62 }
 0xfb9   :  { %1732 = vmatprep.subr.bf16.mxu1 %v1909_v59 }
 0xfbc   :  { %1733 = vmatpush3.bf16.msra.mxu1 %v2071_v0 }
 0xfbd   :  { %1734 = vmatprep.subr.bf16.mxu1 %v1909_v59 }
 0xfc0   :  { %1735 = vmatpush3.bf16.msra.mxu1 %v2080_v1 }
 0xfc1   :  { %1736 = vmatprep.subr.bf16.mxu1 %v1909_v59 }
 0xfc4   :  { %1737 = vmatpush3.bf16.msra.mxu1 %v2092_v2 }
0x1082   :  { %v906_v58 = vpop.f32.mrb[12].mxu1 }
0x1083   :  { %v912_v63 = vadd.f32 %v906_v58, %v2126_v15  ;;  %v944_v3 = vrot.slane %v906_v58, 4  ;;  %v1708_v4 = vpop.f32.mrb[13].mxu1 }
0x1084   :  { %v909_v5 = vpop.f32.mrb[14].mxu1 }
0x1085   :  { %v1506_v6 = vmul.f32 -1.442695, %v912_v63  ;;  %v946_v7 = vadd.f32 %v944_v3, %v2027_v41  ;;  %v1709_v8 = vpop.f32.mrb[15].mxu1 }
0x1087   :  { %1847 = vpow2.f32 %v1506_v6  ;;  %v1508_v9 = vmul.f32 -1.442695, %v946_v7 }
0x1089   :  { %1849 = vpow2.f32 %v1508_v9 }
0x1091   :  { %v1848_v10 = vpop.eup %1847 }
0x1092   :  { %v916_v11 = vadd.f32 1.0, %v1848_v10 }
0x1093   :  { %v1850_v12 = vpop.eup %1849 }
0x1094   :  { %1851 = vrcp.f32 %v916_v11  ;;  %v950_v13 = vadd.f32 1.0, %v1850_v12 }
0x1096   :  { %1853 = vrcp.f32 %v950_v13 }
0x109e   :  { %v1852_v14 = vpop.eup %1851 }
0x109f   :  { %v919_v16 = vmul.f32 2.0, %v1852_v14  ;;  %v921_v25 = vmul.f32 %v1852_v14, %v2264_v32 }
0x10a0   :  { %v1854_v17 = vpop.eup %1853 }
0x10a1   :  { %v1507_v18 = vadd.f32 -1.0, %v919_v16  ;;  %v953_v19 = vmul.f32 2.0, %v1854_v17  ;;  %v958_v27 = vmul.f32 %v1854_v17, %v956_v24 }
0x10a3   :  { %923 = vrot.lane.b32.xlu0 %v1507_v18, %s1907_s0  ;;  %v1509_v20 = vadd.f32 -1.0, %v953_v19 }
0x10a5   :  { %960 = vrot.lane.b32.xlu1 %v1509_v20, %s1907_s0 }
0x1115   :  { %v924_v41 = vpop.permute.xlu0 %923 }
0x1116   :  { %v926_v21 = vmul.f32 %v1852_v14, %v924_v41 }
0x1117   :  { %v961_v22 = vpop.permute.xlu1 %960 }
0x1118   :  { %v963_v23 = vmul.f32 %v1854_v17, %v961_v22  ;;  %928 = vrot.lane.b32.xlu0 %v926_v21, %s1908_s6 }
0x111a   :  { %965 = vrot.lane.b32.xlu1 %v963_v23, %s1908_s6 }
0x118a   :  { %v929_v26 = vpop.permute.xlu0 %928 }
0x118b   :  { %v2306_v48 = vadd.f32 %v929_v26, %v921_v25 }
0x118c   :  { %v966_v28 = vpop.permute.xlu1 %965 }
0x118d   :  { %1855 = vtanh.f32 %v2306_v48  ;;  %v2309_v29 = vadd.f32 %v966_v28, %v958_v27 }
0x118f   :  { %1857 = vtanh.f32 %v2309_v29  ;;  %v1084_v16 = vrot.slane %v2309_v29, 4 }
0x1197   :  { %v1856_v30 = vpop.eup %1855 }
0x1198   :  { %934 = vrot.lane.b32.xlu0 %v1856_v30, %s1907_s0 }
0x1199   :  { %v1858_v31 = vpop.eup %1857 }
0x119a   :  { %971 = vrot.lane.b32.xlu1 %v1858_v31, %s1907_s0 }
0x120a   :  { %v935_v34 = vpop.permute.xlu0 %934 }
0x120b   :  { %v2314_v35 = vmul.f32 %v1852_v14, %v935_v34 }
0x120c   :  { %v972_v32 = vpop.permute.xlu1 %971 }
0x120d   :  { %v974_v37 = vmul.f32 %v1854_v17, %v972_v32  ;;  %v982_v36 = vpack.c.bf16 %v2314_v35, %v2314_v35 }
0x120f   :  { %v975_v38 = vpack.c.bf16 %v974_v37, %v974_v37  ;;  %v987_v40 = vrot.slane %v982_v36, 2 }
0x1211   :  { %v983_v39 = vrot.slane %v975_v38, 2  ;;  %977 = vrot.lane.b32.xlu1 %v975_v38, %s1908_s6 }
0x1213   :  { %984 = vrot.lane.b32.xlu0 %v983_v39, %s1907_s0 }
0x1215   :  { %988 = vrot.lane.b32.xlu1 %v987_v40, %s1911_s4 }
0x1283   :  { %v978_v44 = vpop.permute.xlu1 %977 }
0x1284   :  { %v980_v46 = vsel %vm217_vm6, %v978_v44, 0 }
0x1285   :  { %v985_v47 = vpop.permute.xlu0 %984  ;;  %v981_v49 = vsel %vm310_vm8, %v980_v46, 0 }
0x1286   :  { %v991_v50 = vsel %vm217_vm6, 0, %v985_v47  ;;  %v995_v54 = vrot.slane %v981_v49, 2 }
0x1287   :  { %v989_v51 = vpop.permute.xlu1 %988 }
0x1288   :  { %v993_v53 = vsel %vm310_vm8, %v991_v50, %v989_v51 }
0x1289   :  { %v997_v55 = vrot.slane %v993_v53, 6 }
0x128b   :  { %v1000_v56 = vsel %vm319_vm9, %v995_v54, %v997_v55 }
0x128c   :  { %1723 = vmatmul.mubr.msk.bf16.vlgmr.msra.gmra.mrb[12].mxu0 %vm358_vm10, %v1000_v56 }
0x128d   :  { %1743 = vmatpush3.bf16.msra.mxu0 %v2045_v60  ;;  %1754 = vmatprep.mubr.msk.bf16.mxu0 %vm1910_vm7, %v1909_v59 }
0x128e   :  { %1744 = vmatprep.subr.bf16.mxu0 %v1909_v59 }
0x1291   :  { %1745 = vmatpush3.bf16.msra.mxu0 %v2052_v61 }
0x1292   :  { %1746 = vmatprep.subr.bf16.mxu0 %v1909_v59 }
0x1295   :  { %1747 = vmatpush3.bf16.msra.mxu0 %v2061_v62 }
0x1296   :  { %1748 = vmatprep.subr.bf16.mxu0 %v1909_v59 }
0x1299   :  { %1749 = vmatpush3.bf16.msra.mxu0 %v2071_v0 }
0x129a   :  { %1750 = vmatprep.subr.bf16.mxu0 %v1909_v59 }
0x129d   :  { %1751 = vmatpush3.bf16.msra.mxu0 %v2080_v1 }
0x129e   :  { %1752 = vmatprep.subr.bf16.mxu0 %v1909_v59 }
0x12a1   :  { %1753 = vmatpush3.bf16.msra.mxu0 %v2092_v2 }
0x135f   :  { %v1037_v60 = vpop.f32.mrb[12].mxu0 }
0x1360   :  { %v1043_v57 = vadd.f32 %v1037_v60, %v2126_v15  ;;  %v1074_v61 = vadd.f32 %v1037_v60, %v2031_v45  ;;  %v1724_v58 = vpop.f32.mrb[13].mxu0 }
0x1361   :  { %v1040_v63 = vpop.f32.mrb[14].mxu0 }
0x1362   :  { %v1511_v62 = vmul.f32 -1.442695, %v1043_v57  ;;  %v1513_v3 = vmul.f32 -1.442695, %v1074_v61  ;;  %v1725_v4 = vpop.f32.mrb[15].mxu0 }
0x1364   :  { %1859 = vpow2.f32 %v1511_v62 }
0x1365   :  { %1861 = vpow2.f32 %v1513_v3 }
0x136e   :  { %v1860_v0 = vpop.eup %1859 }
0x136f   :  { %v1862_v5 = vpop.eup %1861  ;;  %v1047_v6 = vadd.f32 1.0, %v1860_v0 }
0x1370   :  { %v1078_v1 = vadd.f32 1.0, %v1862_v5 }
0x1371   :  { %1863 = vrcp.f32 %v1047_v6 }
0x1372   :  { %1865 = vrcp.f32 %v1078_v1 }
0x137b   :  { %v1864_v59 = vpop.eup %1863 }
0x137c   :  { %v1866_v2 = vpop.eup %1865  ;;  %v1050_v7 = vmul.f32 2.0, %v1864_v59  ;;  %v1052_v17 = vmul.f32 %v1864_v59, %v2306_v48 }
0x137d   :  { %v1081_v8 = vmul.f32 2.0, %v1866_v2  ;;  %v1086_v18 = vmul.f32 %v1866_v2, %v1084_v16 }
0x137e   :  { %v1512_v9 = vadd.f32 -1.0, %v1050_v7 }
0x137f   :  { %v1514_v10 = vadd.f32 -1.0, %v1081_v8 }
0x1380   :  { %1054 = vrot.lane.b32.xlu0 %v1512_v9, %s1907_s0 }
0x1381   :  { %1088 = vrot.lane.b32.xlu1 %v1514_v10, %s1907_s0 }
0x13f2   :  { %v1055_v11 = vpop.permute.xlu0 %1054 }
0x13f3   :  { %v1089_v12 = vpop.permute.xlu1 %1088  ;;  %v1057_v13 = vmul.f32 %v1864_v59, %v1055_v11 }
0x13f4   :  { %v1091_v14 = vmul.f32 %v1866_v2, %v1089_v12 }
0x13f5   :  { %1059 = vrot.lane.b32.xlu0 %v1057_v13, %s1908_s6 }
0x13f6   :  { %1093 = vrot.lane.b32.xlu1 %v1091_v14, %s1908_s6 }
0x1467   :  { %v1060_v19 = vpop.permute.xlu0 %1059 }
0x1468   :  { %v1094_v20 = vpop.permute.xlu1 %1093  ;;  %v1062_v41 = vadd.f32 %v1060_v19, %v1052_v17 }
0x1469   :  { %v2348_v21 = vadd.f32 %v1094_v20, %v1086_v18 }
0x146a   :  { %1867 = vtanh.f32 %v1062_v41 }
0x146b   :  { %1869 = vtanh.f32 %v2348_v21 }
0x1474   :  { %v1868_v22 = vpop.eup %1867 }
0x1475   :  { %v1870_v23 = vpop.eup %1869  ;;  %1065 = vrot.lane.b32.xlu0 %v1868_v22, %s1907_s0 }
0x1476   :  { %1099 = vrot.lane.b32.xlu1 %v1870_v23, %s1907_s0 }
0x14e7   :  { %v1066_v24 = vpop.permute.xlu0 %1065 }
0x14e8   :  { %v1100_v25 = vpop.permute.xlu1 %1099  ;;  %v2353_v26 = vmul.f32 %v1864_v59, %v1066_v24  ;;  %v1211_v59 = vrot.slane %v2348_v21, 4 }
0x14e9   :  { %v1102_v48 = vmul.f32 %v1866_v2, %v1100_v25 }
0x14ea   :  { %v1110_v27 = vpack.c.bf16 %v2353_v26, %v2353_v26 }
0x14eb   :  { %v1103_v28 = vpack.c.bf16 %v1102_v48, %v1102_v48 }
0x14ec   :  { %v1114_v29 = vrot.slane %v1110_v27, 2 }
0x14ed   :  { %1111 = vrot.lane.b32.xlu0 %v1103_v28, %s1907_s0 }
0x14ee   :  { %1115 = vrot.lane.b32.xlu1 %v1114_v29, %s1911_s4 }
0x14f1   :  { %1105 = vrot.lane.b32.xlu0 %v1103_v28, %s1908_s6 }
0x155f   :  { %v1112_v30 = vpop.permute.xlu0 %1111 }
0x1560   :  { %v1118_v31 = vsel %vm217_vm6, 0, %v1112_v30  ;;  %v1116_v34 = vpop.permute.xlu1 %1115 }
0x1561   :  { %v1120_v32 = vsel %vm310_vm8, %v1118_v31, %v1116_v34 }
0x1562   :  { %v1122_v37 = vrot.slane %v1120_v32, 6 }
0x1563   :  { %v1106_v36 = vpop.permute.xlu0 %1105 }
0x1564   :  { %v1108_v38 = vsel %vm217_vm6, %v1106_v36, 0 }
0x1565   :  { %v1109_v39 = vsel %vm310_vm8, %v1108_v38, 0 }
0x1566   :  { %v1124_v40 = vsel %vm319_vm9, %v1109_v39, %v1122_v37 }
0x1567   :  { %1739 = vmatmul.mubr.msk.bf16.vlgmr.msra.gmra.mrb[16].mxu1 %vm358_vm10, %v1124_v40 }
0x163a   :  { %v1161_v44 = vpop.f32.mrb[16].mxu1 }
0x163b   :  { %v1167_v46 = vadd.f32 %v1161_v44, %v2126_v15  ;;  %v1199_v47 = vrot.slane %v1161_v44, 4  ;;  %v1740_v49 = vpop.f32.mrb[17].mxu1 }
0x163c   :  { %v1164_v50 = vpop.f32.mrb[18].mxu1 }
0x163d   :  { %v1516_v51 = vmul.f32 -1.442695, %v1167_v46  ;;  %v1201_v53 = vadd.f32 %v1199_v47, %v2031_v45  ;;  %v1741_v54 = vpop.f32.mrb[19].mxu1 }
0x163f   :  { %1871 = vpow2.f32 %v1516_v51  ;;  %v1518_v55 = vmul.f32 -1.442695, %v1201_v53 }
0x1641   :  { %1873 = vpow2.f32 %v1518_v55 }
0x1649   :  { %v1872_v56 = vpop.eup %1871 }
0x164a   :  { %v1171_v60 = vadd.f32 1.0, %v1872_v56 }
0x164b   :  { %v1874_v57 = vpop.eup %1873 }
0x164c   :  { %1875 = vrcp.f32 %v1171_v60  ;;  %v1205_v61 = vadd.f32 1.0, %v1874_v57  ;;  %v1792_v57 = vld [vmem:[%s2440_s7 + $0x8] sm:$0xff]  }
0x164e   :  { %1877 = vrcp.f32 %v1205_v61 }
0x1656   :  { %v1876_v58 = vpop.eup %1875 }
0x1657   :  { %v1174_v63 = vmul.f32 2.0, %v1876_v58  ;;  %v1176_v2 = vmul.f32 %v1876_v58, %v1062_v41 }
0x1658   :  { %v1878_v62 = vpop.eup %1877 }
0x1659   :  { %v1517_v3 = vadd.f32 -1.0, %v1174_v63  ;;  %v1208_v4 = vmul.f32 2.0, %v1878_v62  ;;  %v1213_v9 = vmul.f32 %v1878_v62, %v1211_v59 }
0x165b   :  { %1178 = vrot.lane.b32.xlu0 %v1517_v3, %s1907_s0  ;;  %v1519_v0 = vadd.f32 -1.0, %v1208_v4 }
0x165d   :  { %1215 = vrot.lane.b32.xlu1 %v1519_v0, %s1907_s0 }
0x16cd   :  { %v1179_v45 = vpop.permute.xlu0 %1178 }
0x16ce   :  { %v1181_v5 = vmul.f32 %v1876_v58, %v1179_v45 }
0x16cf   :  { %v1216_v6 = vpop.permute.xlu1 %1215 }
0x16d0   :  { %v1218_v1 = vmul.f32 %v1878_v62, %v1216_v6  ;;  %1183 = vrot.lane.b32.xlu0 %v1181_v5, %s1908_s6  ;;  %v1523_v6 = vld [vmem:[%s2441_s8] ss:$0 sm:$0xff] }
0x16d2   :  { %1220 = vrot.lane.b32.xlu1 %v1218_v1, %s1908_s6 }
0x1742   :  { %v1184_v7 = vpop.permute.xlu0 %1183 }
0x1743   :  { %v1186_v8 = vadd.f32 %v1184_v7, %v1176_v2 }
0x1744   :  { %v1221_v10 = vpop.permute.xlu1 %1220 }
0x1745   :  { %1879 = vtanh.f32 %v1186_v8  ;;  %v1223_v11 = vadd.f32 %v1221_v10, %v1213_v9 }
0x1747   :  { %1881 = vtanh.f32 %v1223_v11 }
0x174f   :  { %v1880_v12 = vpop.eup %1879 }
0x1750   :  { %1189 = vrot.lane.b32.xlu0 %v1880_v12, %s1907_s0 }
0x1751   :  { %v1882_v13 = vpop.eup %1881 }
0x1752   :  { %1226 = vrot.lane.b32.xlu1 %v1882_v13, %s1907_s0 }
0x17c2   :  { %v1190_v14 = vpop.permute.xlu0 %1189 }
0x17c3   :  { %v1192_v16 = vmul.f32 %v1876_v58, %v1190_v14 }
0x17c4   :  { %v1227_v17 = vpop.permute.xlu1 %1226 }
0x17c5   :  { %v1229_v18 = vmul.f32 %v1878_v62, %v1227_v17  ;;  %v1237_v19 = vpack.c.bf16 %v1192_v16, %v1192_v16 }
0x17c7   :  { %v1230_v20 = vpack.c.bf16 %v1229_v18, %v1229_v18  ;;  %v1242_v21 = vrot.slane %v1237_v19, 2 }
0x17c9   :  { %v1238_v41 = vrot.slane %v1230_v20, 2  ;;  %1232 = vrot.lane.b32.xlu1 %v1230_v20, %s1908_s6 }
0x17cb   :  { %1239 = vrot.lane.b32.xlu0 %v1238_v41, %s1907_s0 }
0x17cd   :  { %1243 = vrot.lane.b32.xlu1 %v1242_v21, %s1911_s4 }
0x183b   :  { %v1233_v22 = vpop.permute.xlu1 %1232 }
0x183c   :  { %v1235_v23 = vsel %vm217_vm6, %v1233_v22, 0 }
0x183d   :  { %v1240_v24 = vpop.permute.xlu0 %1239  ;;  %v1236_v25 = vsel %vm310_vm8, %v1235_v23, 0 }
0x183e   :  { %v1246_v48 = vsel %vm217_vm6, 0, %v1240_v24  ;;  %v1250_v29 = vrot.slane %v1236_v25, 2 }
0x183f   :  { %v1244_v27 = vpop.permute.xlu1 %1243 }
0x1840   :  { %v1248_v28 = vsel %vm310_vm8, %v1246_v48, %v1244_v27 }
0x1841   :  { %v1252_v30 = vrot.slane %v1248_v28, 6 }
0x1843   :  { %v1255_v31 = vsel %vm319_vm9, %v1250_v29, %v1252_v30 }
0x1844   :  { %1755 = vmatmul.mubr.msk.bf16.vlgmr.msra.gmra.mrb[16].mxu0 %vm358_vm10, %v1255_v31 }
0x1917   :  { %v1292_v34 = vpop.f32.mrb[16].mxu0 }
0x1918   :  { %v1298_v32 = vadd.f32 %v1292_v34, %v2126_v15  ;;  %v1756_v37 = vpop.f32.mrb[17].mxu0 }
0x1919   :  { %v1295_v36 = vpop.f32.mrb[18].mxu0 }
0x191a   :  { %v1521_v38 = vmul.f32 -1.442695, %v1298_v32  ;;  %v1757_v39 = vpop.f32.mrb[19].mxu0 }
0x191c   :  { %1883 = vpow2.f32 %v1521_v38 }
0x1926   :  { %v1884_v40 = vpop.eup %1883 }
0x1927   :  { %v1302_v44 = vadd.f32 1.0, %v1884_v40 }
0x1929   :  { %1885 = vrcp.f32 %v1302_v44 }
0x1933   :  { %v1886_v46 = vpop.eup %1885 }
0x1934   :  { %v1305_v47 = vmul.f32 2.0, %v1886_v46  ;;  %v1307_v15 = vmul.f32 %v1886_v46, %v1186_v8 }
0x1936   :  { %v1522_v49 = vadd.f32 -1.0, %v1305_v47 }
0x1938   :  { %1309 = vrot.lane.b32.xlu0 %v1522_v49, %s1907_s0 }
0x19aa   :  { %v1310_v50 = vpop.permute.xlu0 %1309 }
0x19ab   :  { %v1312_v51 = vmul.f32 %v1886_v46, %v1310_v50 }
0x19ad   :  { %1314 = vrot.lane.b32.xlu1 %v1312_v51, %s1908_s6 }
0x19b1   :  { %428 = vrot.lane.b32.xlu1 %v2143_v52, %s1908_s6 }
0x19b5   :  { %684 = vrot.lane.b32.xlu1 %v2229_v42, %s1908_s6 }
0x19b9   :  { %939 = vrot.lane.b32.xlu1 %v2314_v35, %s1908_s6  ;;  %v1791_v35 = vld [vmem:[%s2440_s7] sm:$0xff]  }
0x19ba   :  { %1758 = vmatprep.subr.bf16.mxu1 %v1791_v35 }
0x19bb   :  { %1759 = vmatpush3.bf16.msra.mxu1 %v1791_v35 }
0x19bc   :  { %1760 = vmatprep.subr.bf16.mxu1 %v1792_v57 }
0x19bd   :  { %1194 = vrot.lane.b32.xlu1 %v1192_v16, %s1908_s6 }
0x19bf   :  { %1761 = vmatpush3.bf16.msra.mxu1 %v1792_v57 }
0x1a1f   :  { %v1315_v53 = vpop.permute.xlu1 %1314 }
0x1a20   :  { %v1317_v54 = vadd.f32 %v1315_v53, %v1307_v15 }
0x1a22   :  { %1887 = vtanh.f32 %v1317_v54 }
0x1a23   :  { %v429_v55 = vpop.permute.xlu1 %428 }
0x1a24   :  { %432 = vst.msk [vmem:[#allocation2 - $0x4] sm:$0xf0] %vm431_vm11, %v429_v55 }
0x1a27   :  { %v685_v56 = vpop.permute.xlu1 %684 }
0x1a28   :  { %687 = vst.msk [vmem:[#allocation2 + $0x4] sm:$0xf0] %vm431_vm11, %v685_v56 }
0x1a2b   :  { %v940_v52 = vpop.permute.xlu1 %939 }
0x1a2c   :  { %v1888_v60 = vpop.eup %1887  ;;  %942 = vst.msk [vmem:[#allocation2 + $0xc] sm:$0xf0] %vm431_vm11, %v940_v52 }
0x1a2d   :  { %1320 = vrot.lane.b32.xlu0 %v1888_v60, %s1907_s0 }
0x1a2f   :  { %v1195_v42 = vpop.permute.xlu1 %1194 }
0x1a30   :  { %1197 = vst.msk [vmem:[#allocation2 + $0x14] sm:$0xf0] %vm431_vm11, %v1195_v42 }
0x1a31   :  { %560 = vrot.lane.b32.xlu0 %v2186_v43, %s1908_s6 }
0x1a35   :  { %815 = vrot.lane.b32.xlu0 %v2272_v33, %s1908_s6 }
0x1a39   :  { %1070 = vrot.lane.b32.xlu0 %v2353_v26, %s1908_s6 }
0x1a9f   :  { %v1321_v61 = vpop.permute.xlu0 %1320 }
0x1aa0   :  { %v1323_v43 = vmul.f32 %v1886_v46, %v1321_v61 }
0x1aa2   :  { %1325 = vrot.lane.b32.xlu0 %v1323_v43, %s1908_s6 }
0x1aa3   :  { %v561_v33 = vpop.permute.xlu0 %560 }
0x1aa4   :  { %563 = vst.msk [vmem:[#allocation2] sm:$0xf0] %vm431_vm11, %v561_v33 }
0x1aa7   :  { %v816_v26 = vpop.permute.xlu0 %815 }
0x1aa8   :  { %818 = vst.msk [vmem:[#allocation2 + $0x8] sm:$0xf0] %vm431_vm11, %v816_v26 }
0x1aab   :  { %v1071_v58 = vpop.permute.xlu0 %1070  ;;  %v1329_v63 = vld [vmem:[#allocation2] sm:$0xff] }
0x1aac   :  { %1073 = vst.msk [vmem:[#allocation2 + $0x10] sm:$0xf0] %vm431_vm11, %v1071_v58 }
0x1aaf   :  { %v1330_v62 = vld [vmem:[#allocation2 + $0x8] sm:$0xff] }
0x1ab0   :  { %v1333_v3 = vpack.c.bf16 %v1330_v62, %v1329_v63 }
0x1ab2   :  { %1762 = vmatprep.mubr.msk.bf16.mxu1 %vm217_vm6, %v1333_v3 }
0x1ab3   :  { %v1331_v0 = vld [vmem:[#allocation2 + $0x10] sm:$0xff] }
0x1b14   :  { %v1326_v4 = vpop.permute.xlu0 %1325 }
0x1b15   :  { %1328 = vst.msk [vmem:[#allocation2 + $0x18] sm:$0xf0] %vm431_vm11, %v1326_v4 }
0x1b1c   :  { %v1332_v45 = vld [vmem:[#allocation2 + $0x18] sm:$0xff] }
0x1b1d   :  { %v1334_v5 = vpack.c.bf16 %v1332_v45, %v1331_v0 }
0x1b1f   :  { %1763 = vmatmul.mubr.msk.bf16.vlgmr.msra.gmra.mrb[20].mxu1 %vm217_vm6, %v1334_v5 }
0x1bf2   :  { %v1764_v1 = vpop.f32.mrb[20].mxu1 }
0x1bf3   :  { %v1398_v59 = vpop.f32.mrb[21].mxu1  ;;  %v1407_v11 = vadd.f32 %v1764_v1, %v1523_v6 }
0x1bf4   :  { %v1399_v2 = vadd.f32 %v1523_v6, %v1398_v59  ;;  %v1765_v7 = vpop.f32.mrb[22].mxu1 }
0x1bf5   :  { %v1401_v8 = vpop.f32.mrb[23].mxu1  ;;  %v1410_v10 = vadd.f32 %v1765_v7, %v1523_v6 }
0x1bf6   :  { %v1402_v9 = vadd.f32 %v1523_v6, %v1401_v8  ;;  %1413 = vmax.xlane.f32.xlu1 %v1399_v2 }
0x1bf8   :  { %1415 = vmax.xlane.f32.xlu0 %v1402_v9 }
0x1bfa   :  { %1419 = vmax.xlane.f32.xlu1 %v1410_v10 }
0x1bfc   :  { %1417 = vmax.xlane.f32.xlu0 %v1407_v11 }
0x1c83   :  { %v1414_v12 = vpop.xlane.xlu1 %1413 }
0x1c84   :  { %v1421_v13 = vsub.f32 %v1399_v2, %v1414_v12 }
0x1c85   :  { %v1416_v14 = vpop.xlane.xlu0 %1415 }
0x1c86   :  { %v1425_v16 = vmul.f32 1.442695, %v1421_v13  ;;  %v1422_v17 = vsub.f32 %v1402_v9, %v1416_v14 }
0x1c87   :  { %v1420_v18 = vpop.xlane.xlu1 %1419 }
0x1c88   :  { %1889 = vpow2.f32 %v1425_v16  ;;  %v1427_v19 = vmul.f32 1.442695, %v1422_v17  ;;  %v1424_v20 = vsub.f32 %v1410_v10, %v1420_v18 }
0x1c89   :  { %v1418_v41 = vpop.xlane.xlu0 %1417 }
0x1c8a   :  { %1891 = vpow2.f32 %v1427_v19  ;;  %v1431_v21 = vmul.f32 1.442695, %v1424_v20  ;;  %v1423_v22 = vsub.f32 %v1407_v11, %v1418_v41 }
0x1c8c   :  { %v1429_v23 = vmul.f32 1.442695, %v1423_v22  ;;  %1893 = vpow2.f32 %v1431_v21 }
0x1c8e   :  { %1895 = vpow2.f32 %v1429_v23 }
0x1c92   :  { %v1890_v24 = vpop.eup %1889 }
0x1c93   :  { %1433 = vadd.xlane.f32.xlu0 %v1890_v24 }
0x1c94   :  { %v1892_v25 = vpop.eup %1891 }
0x1c95   :  { %1435 = vadd.xlane.f32.xlu1 %v1892_v25 }
0x1c96   :  { %v1894_v48 = vpop.eup %1893 }
0x1c98   :  { %v1896_v27 = vpop.eup %1895 }
0x1c99   :  { %1437 = vadd.xlane.f32.xlu0 %v1896_v27  ;;  %1439 = vadd.xlane.f32.xlu1 %v1894_v48 }
0x1d20   :  { %v1434_v28 = vpop.xlane.xlu0 %1433 }
0x1d21   :  { %1897 = vlog2.f32 %v1434_v28 }
0x1d22   :  { %v1436_v29 = vpop.xlane.xlu1 %1435 }
0x1d23   :  { %1899 = vlog2.f32 %v1436_v29 }
0x1d26   :  { %v1438_v30 = vpop.xlane.xlu0 %1437  ;;  %v1440_v31 = vpop.xlane.xlu1 %1439 }
0x1d27   :  { %1901 = vlog2.f32 %v1438_v30 }
0x1d28   :  { %1903 = vlog2.f32 %v1440_v31 }
0x1d2b   :  { %v1898_v34 = vpop.eup %1897 }
0x1d2c   :  { %v1442_v32 = vmul.f32 0.6931472, %v1898_v34 }
0x1d2d   :  { %v1900_v37 = vpop.eup %1899 }
0x1d2e   :  { %v1449_v36 = vsub.f32 %v1421_v13, %v1442_v32  ;;  %v1444_v38 = vmul.f32 0.6931472, %v1900_v37 }
0x1d30   :  { %1453 = vst [vmem:[%s2442_s9] sm:$0xff] %v1449_v36  ;;  %v1450_v39 = vsub.f32 %v1422_v17, %v1444_v38 }
0x1d31   :  { %v1902_v40 = vpop.eup %1901 }
0x1d32   :  { %v1904_v44 = vpop.eup %1903  ;;  %1454 = vst [vmem:[%s2442_s9 + $0x8] sm:$0xff] %v1450_v39  ;;  %v1446_v46 = vmul.f32 0.6931472, %v1902_v40 }
0x1d33   :  { %v1448_v47 = vmul.f32 0.6931472, %v1904_v44 }
0x1d34   :  { %v1451_v49 = vsub.f32 %v1423_v22, %v1446_v46 }
0x1d35   :  { %v1452_v50 = vsub.f32 %v1424_v20, %v1448_v47 }
0x1d36   :  { %1455 = vst [vmem:[%s2442_s9 + $0x10] sm:$0xff] %v1451_v49 }
0x1d37   :  { %1456 = vst [vmem:[%s2442_s9 + $0x18] sm:$0xff] %v1452_v50 }

</bundles_post_ra>
